<compile_context>
chip_gen: v7x
topology: tpu7x:2x2x1
jax: 0.10.0
libtpu: 0.0.40
codegen_flags: <defaults>
</compile_context>

<pallas_src>
import functools

import numpy as np
import jax
import jax.numpy as jnp
from jax.experimental import pallas as pl
from jax.experimental.pallas import tpu as pltpu

LATENT_C = 4
IMG_C = 3


def _pick_hw_block(hw):
    """Largest lane-dense block that still gives >=2 blocks (megacore)."""
    for blk in (1024, 512, 256, 128):
        if hw % blk == 0 and hw // blk >= 2:
            return blk
    return hw


# --------------------------------------------------------------------------
# Pallas kernels
# --------------------------------------------------------------------------
def ddim_fused_kernel(coef_sm, wx_sm, bias_sm, log_slot_sm, eps_slot_sm,
                      xT_ref, eps_ref, xlog_ref, px0_ref, x_acc, *, B, C):
    """All DDIM steps for one spatial block.

    grid = (HW_blocks [parallel], T steps [arbitrary])

    coef_sm : (T, 8)  f32 SMEM  per-step [px0_x, px0_e, xn_x, xn_e, sigma, ...]
    wx_sm   : (C, C)  f32 SMEM  synthetic "UNet" channel-mix weights
    bias_sm : (B, C)  f32 SMEM  CFG bias  = (uc + scale*(c-uc)) @ Wctx  (step-invariant)
    xT_ref  : (B, C, HWB)       initial latent block (resident across steps)
    eps_ref : (B, C, HWB)       provided stochastic eps for this step
    xlog_ref/px0_ref : (B, C, HWB) logged-slot outputs (resident; HBM writeback
                                   only when the slot index changes)
    x_acc   : (B, C, HWB) VMEM  latent carried across the step axis
    """
    t = pl.program_id(1)

    @pl.when(t == 0)
    def _():
        x_acc[...] = xT_ref[...]

    x = x_acc[...]          # (B, C, HWB) value; loads happen before any store
    eps = eps_ref[...]      # (B, C, HWB)

    c_px0_x = coef_sm[t, 0]
    c_px0_e = coef_sm[t, 1]
    c_xn_x = coef_sm[t, 2]
    c_xn_e = coef_sm[t, 3]
    c_sig = coef_sm[t, 4]

    for b in range(B):
        for k in range(C):
            # 4-wide channel mix as unrolled scalar*vector FMAs on the VPU.
            e = x[b, 0] * wx_sm[0, k]
            for c in range(1, C):
                e = e + x[b, c] * wx_sm[c, k]
            e = e + bias_sm[b, k]          # classifier-free guidance bias

            xk = x[b, k]
            px0 = c_px0_x * xk - c_px0_e * e
            xn = c_xn_x * xk + c_xn_e * e + c_sig * eps[b, k]

            x_acc[b, k, :] = xn
            xlog_ref[b, k, :] = xn
            px0_ref[b, k, :] = px0


def decode_post_kernel(wdec_sm, bdec_sm, z_ref, img_ref, *, B, C):
    """decode_first_stage (1x1 conv + tanh) fused with Normalize(-1, 2).

    z_ref : (B, C, HWB), img_ref : (B, 3, HWB)  (HW lane-dense)
    """
    z = z_ref[...]
    for b in range(B):
        for j in range(IMG_C):
            acc = z[b, 0] * wdec_sm[0, j]
            for c in range(1, C):
                acc = acc + z[b, c] * wdec_sm[c, j]
            acc = acc + bdec_sm[j]
            # tanh "VAE" output in [-1,1]; post_process == (x + 1) / 2
            img_ref[b, j, :] = (jnp.tanh(acc) + 1.0) * 0.5


# --------------------------------------------------------------------------
# pallas_call wrappers
# --------------------------------------------------------------------------
def ddim_sample_fused(x_T, eps_stack, coefs, wx, bias, log_slot, eps_slot,
                      n_logs):
    B, C, HW = x_T.shape
    T = coefs.shape[0]
    HWB = _pick_hw_block(HW)
    n_hw = HW // HWB
    kern = functools.partial(ddim_fused_kernel, B=B, C=C)

    def xT_map(hw, t, coefs, wx, bias, log_slot, eps_slot):
        return (0, 0, hw)

    def eps_map(hw, t, coefs, wx, bias, log_slot, eps_slot):
        return (eps_slot[t], 0, 0, hw)

    def out_map(hw, t, coefs, wx, bias, log_slot, eps_slot):
        # same slot across un-logged steps -> block stays resident in VMEM and
        # is only written to HBM when the slot changes (i.e. after a logged step)
        return (log_slot[t], 0, 0, hw)

    out_shape = (jax.ShapeDtypeStruct((n_logs, B, C, HW), jnp.float32),
                 jax.ShapeDtypeStruct((n_logs, B, C, HW), jnp.float32))
    xlog, px0log = pl.pallas_call(
        kern,
        out_shape=out_shape,
        grid_spec=pltpu.PrefetchScalarGridSpec(
            num_scalar_prefetch=5,
            grid=(n_hw, T),
            in_specs=[pl.BlockSpec((B, C, HWB), xT_map),
                      pl.BlockSpec((None, B, C, HWB), eps_map)],
            out_specs=(pl.BlockSpec((None, B, C, HWB), out_map),
                       pl.BlockSpec((None, B, C, HWB), out_map)),
            scratch_shapes=[pltpu.VMEM((B, C, HWB), jnp.float32)]),
        compiler_params=pltpu.CompilerParams(
            dimension_semantics=("parallel", "arbitrary")),
    )(coefs, wx, bias, log_slot, eps_slot, x_T, eps_stack)
    return xlog, px0log


def decode_and_postprocess(z_stack, wdec, bdec):
    K, B, C, HW = z_stack.shape
    HWB = _pick_hw_block(HW)
    n_hw = HW // HWB
    kern = functools.partial(decode_post_kernel, B=B, C=C)

    def idx_map(k, hw, wdec, bdec):
        return (k, 0, 0, hw)

    return pl.pallas_call(
        kern,
        out_shape=jax.ShapeDtypeStruct((K, B, IMG_C, HW), jnp.float32),
        grid_spec=pltpu.PrefetchScalarGridSpec(
            num_scalar_prefetch=2,
            grid=(K, n_hw),
            in_specs=[pl.BlockSpec((None, B, C, HWB), idx_map)],
            out_specs=pl.BlockSpec((None, B, IMG_C, HWB), idx_map)),
        compiler_params=pltpu.CompilerParams(
            dimension_semantics=("parallel", "parallel")),
    )(wdec, bdec, z_stack)


# --------------------------------------------------------------------------
# Wrapper mirroring SDStochasticTextWrapper.forward
# --------------------------------------------------------------------------
class SDStochasticTextWrapperPallas:
    def __init__(self, custom_steps, eta, white_box_steps, skip_steps,
                 encoder_unconditional_guidance_scales,
                 decoder_unconditional_guidance_scales,
                 n_trials, image_size=16, channels=LATENT_C,
                 ctx_dim=32, ctx_seq=8, log_every_t=10):
        self.custom_steps = custom_steps
        self.eta = eta
        self.white_box_steps = white_box_steps
        self.skip_steps = list(skip_steps)
        self.encoder_unconditional_guidance_scales = list(
            encoder_unconditional_guidance_scales)
        self.decoder_unconditional_guidance_scales = list(
            decoder_unconditional_guidance_scales)
        self.n_trials = n_trials
        self.image_size = image_size
        self.channels = channels
        self.ctx_dim = ctx_dim
        self.ctx_seq = ctx_seq
        self.log_every_t = log_every_t

        # deterministic synthetic weights (stand-ins for UNet / VAE decoder)
        key = jax.random.PRNGKey(0)
        kx, kc, kd, kb = jax.random.split(key, 4)
        self.wx = 0.1 * jax.random.normal(kx, (channels, channels), jnp.float32)
        self.wctx = 0.1 * jax.random.normal(kc, (ctx_dim, channels), jnp.float32)
        self.wdec = 0.3 * jax.random.normal(kd, (channels, IMG_C), jnp.float32)
        self.bdec = 0.01 * jax.random.normal(kb, (IMG_C,), jnp.float32)

        # DDIM schedule (SD linear-sqrt beta schedule, 1000 train steps)
        betas = np.linspace(0.00085 ** 0.5, 0.012 ** 0.5, 1000,
                            dtype=np.float64) ** 2
        alphas_cumprod = np.cumprod(1.0 - betas)
        c_step = 1000 // custom_steps
        # TODO(synk): LDM uses range(0,1000,c)+1 which can index past the end;
        # clip to stay in-bounds of the 1000-entry alpha table.
        ddim_timesteps = np.clip(np.arange(custom_steps) * c_step + 1, 0, 999)
        self.ddim_alphas = alphas_cumprod[ddim_timesteps]
        self.ddim_alphas_prev = np.asarray(
            [alphas_cumprod[0]] + alphas_cumprod[ddim_timesteps[:-1]].tolist())
        self.ddim_sigmas = eta * np.sqrt(
            (1.0 - self.ddim_alphas_prev) / (1.0 - self.ddim_alphas)
            * (1.0 - self.ddim_alphas / self.ddim_alphas_prev))

    # -------------------- helpers --------------------
    def _text_context(self, texts, bsz):
        # TODO(synk): real model uses a frozen CLIP text encoder; synthesize a
        # deterministic embedding per string instead.
        if len(texts) == 1:
            texts = texts * bsz
        embs = []
        for t in texts:
            seed = sum(ord(ch) for ch in t) % (2 ** 31 - 1)
            embs.append(jax.random.normal(jax.random.PRNGKey(seed),
                                          (self.ctx_seq, self.ctx_dim),
                                          jnp.float32))
        return jnp.stack(embs, axis=0)  # (B, seq, D)

    def _cfg_bias(self, decode_text, bsz, scale):
        """Classifier-free guidance folded into one step-invariant (B,C) bias:
        e = e_base + uc@W + scale*(c@W - uc@W) = e_base + (uc+scale*(c-uc))@W."""
        c = jnp.mean(self._text_context(decode_text, bsz), axis=1)   # (B, D)
        uc = jnp.mean(self._text_context([''], bsz), axis=1)         # (B, D)
        pooled = uc + scale * (c - uc)
        return jnp.dot(pooled, self.wctx)                            # (B, C)

    def _step_tables(self, skip_steps, n_eps):
        """Per-step DDIM coefficients (FMA form), output-slot and eps-slot tables."""
        total = self.custom_steps
        n_iters = total - skip_steps
        assert n_iters >= 1
        idxs = list(range(total - 1 - skip_steps, -1, -1))
        coefs = np.zeros((n_iters, 8), dtype=np.float32)
        logged = []
        for it, idx in enumerate(idxs):
            a_t = float(self.ddim_alphas[idx])
            a_prev = float(self.ddim_alphas_prev[idx])
            sigma = float(self.ddim_sigmas[idx])
            sqrt_at = np.sqrt(a_t)
            sqrt_1mat = np.sqrt(1.0 - a_t)
            sqrt_aprev = np.sqrt(a_prev)
            dir_coef = np.sqrt(max(1.0 - a_prev - sigma ** 2, 0.0))
            px0_x = 1.0 / sqrt_at                       # pred_x0 = px0_x*x - px0_e*e
            px0_e = sqrt_1mat / sqrt_at
            xn_x = sqrt_aprev / sqrt_at                 # x_next = xn_x*x + xn_e*e + sig*eps
            xn_e = dir_coef - sqrt_aprev * sqrt_1mat / sqrt_at
            # TODO(synk): reference draws fresh randn for steps beyond the
            # provided eps list; here the stochastic term is dropped (sigma=0).
            sig = sigma if it < n_eps else 0.0
            coefs[it, :5] = [px0_x, px0_e, xn_x, xn_e, sig]
            if it % self.log_every_t == 0 or it == n_iters - 1:
                logged.append(it)
        logged = sorted(set(logged))
        log_slot = np.array([sum(1 for l in logged if l < t)
                             for t in range(n_iters)], dtype=np.int32)
        eps_slot = np.minimum(np.arange(n_iters),
                              max(n_eps - 1, 0)).astype(np.int32)
        return (jnp.asarray(coefs), jnp.asarray(log_slot),
                jnp.asarray(eps_slot), len(logged))

    # -------------------- generate / forward --------------------
    def generate(self, z_ensemble, decode_text):
        img_ensemble = []
        intermediates_ensemble = []
        H = self.image_size
        HW = H * H
        for i, z in enumerate(z_ensemble):
            skip_steps = self.skip_steps[i % len(self.skip_steps)]
            bsz = z.shape[0]
            n = self.white_box_steps - skip_steps if self.white_box_steps != -1 else 1
            eps_all = z.reshape(bsz, n, self.channels, H, H)
            # lane-dense (B, C, HW) layout straight from NCHW (no transpose)
            x_T = eps_all[:, 0].reshape(bsz, self.channels, HW)
            n_eps = n - 1
            if n_eps > 0:
                eps_stack = jnp.transpose(eps_all[:, 1:], (1, 0, 2, 3, 4)
                                          ).reshape(n_eps, bsz, self.channels, HW)
            else:
                eps_stack = jnp.zeros((1, bsz, self.channels, HW), jnp.float32)
            coefs, log_slot, eps_slot, n_logs = self._step_tables(skip_steps,
                                                                  n_eps)

            for scale in self.decoder_unconditional_guidance_scales:
                bias = self._cfg_bias(decode_text, bsz, scale)       # (B, C)
                xlog, px0log = ddim_sample_fused(
                    x_T, eps_stack, coefs, self.wx, bias,
                    log_slot, eps_slot, n_logs)

                # decode_first_stage + post_process fused, batched over the
                # initial latent, all logged x's and all logged pred_x0's.
                dec_in = jnp.concatenate([x_T[None], xlog, px0log], axis=0)
                imgs = decode_and_postprocess(dec_in, self.wdec, self.bdec)
                imgs = imgs.reshape(-1, bsz, IMG_C, H, H)            # NCHW

                x_inter = [imgs[j] for j in range(0, 1 + n_logs)]
                pred_x0 = [imgs[j] for j in range(1 + n_logs, 1 + 2 * n_logs)]
                img = imgs[n_logs]   # decode(final sample) == decode(last logged x)

                img_ensemble.append(img)
                intermediates_ensemble.append({'x_inter': x_inter,
                                               'pred_x0': pred_x0})
        return img_ensemble, intermediates_ensemble

    def __call__(self, z_ensemble, original_img, encode_text, decode_text):
        img_ensemble, intermediates_ensemble = self.generate(z_ensemble,
                                                             decode_text)
        assert len(img_ensemble) == (
            len(self.decoder_unconditional_guidance_scales)
            * len(self.encoder_unconditional_guidance_scales)
            * len(self.skip_steps) * self.n_trials)
        # post_process (Normalize(mean=-1,std=2) == (x+1)/2) is fused into the
        # decode kernel, so these tensors are already post-processed.
        img = img_ensemble[0]
        processed_intermediates = {
            'x_inter': list(intermediates_ensemble[0]['x_inter']),
            'pred_x0': list(intermediates_ensemble[0]['pred_x0']),
        }
        return img, processed_intermediates


# --------------------------------------------------------------------------
if __name__ == "__main__":
    B, C, H = 2, LATENT_C, 16
    white_box_steps = 3

    wrapper = SDStochasticTextWrapperPallas(
        custom_steps=3, eta=1.0, white_box_steps=white_box_steps,
        skip_steps=[0],
        encoder_unconditional_guidance_scales=[1.0],
        decoder_unconditional_guidance_scales=[3.0],
        n_trials=1, image_size=H, channels=C, ctx_dim=32, ctx_seq=8)

    key = jax.random.PRNGKey(0)
    kz, ki = jax.random.split(key)
    # z holds [x_T, eps_T, eps_{T-1}] flattened, as produced by encode()
    z = jax.random.normal(kz, (B, white_box_steps * C * H * H), jnp.float32)
    original_img = jax.random.normal(ki, (B, 3, H, H), jnp.float32)  # unused in forward

    img, intermediates = wrapper(
        z_ensemble=[z],
        original_img=original_img,
        encode_text=["a photo of a cat"],
        decode_text=["a photo of a dog"],
    )

    jax.block_until_ready(img)
    for t in intermediates['x_inter'] + intermediates['pred_x0']:
        jax.block_until_ready(t)

    assert img.shape == (B, IMG_C, H, H)
    assert bool(jnp.all(jnp.isfinite(img)))
    print("KERNEL_OK")
</pallas_src>

<mosaic_0001>
module attributes {stable_mosaic.version = 11 : i64} {
  func.func @ddim_fused_kernel(%arg0: i32, %arg1: i32, %arg2: memref<3x8xf32, #tpu.memory_space<smem>>, %arg3: memref<4x4xf32, #tpu.memory_space<smem>>, %arg4: memref<2x4xf32, #tpu.memory_space<smem>>, %arg5: memref<3xi32, #tpu.memory_space<smem>>, %arg6: memref<3xi32, #tpu.memory_space<smem>>, %arg7: memref<2x4x128xf32, #tpu.memory_space<vmem>>, %arg8: memref<1x2x4x128xf32, #tpu.memory_space<vmem>>, %arg9: memref<1x2x4x128xf32, #tpu.memory_space<vmem>>, %arg10: memref<1x2x4x128xf32, #tpu.memory_space<vmem>>, %arg11: memref<2x4x128xf32, #tpu.memory_space<vmem>>) attributes {dimension_semantics = [#tpu.dimension_semantics<parallel>, #tpu.dimension_semantics<arbitrary>], iteration_bounds = array<i64: 2, 3>, scalar_prefetch = 5 : i64, scratch_operands = 1 : i64, tpu.core_type = #tpu.core_type<tc>, window_params = [{transform_indices = @transform_0, window_bounds = array<i64: 2, 4, 128>}, {transform_indices = @transform_1, window_bounds = array<i64: 1, 2, 4, 128>}, {transform_indices = @transform_2, window_bounds = array<i64: 1, 2, 4, 128>}, {transform_indices = @transform_3, window_bounds = array<i64: 1, 2, 4, 128>}]} {
    %c0_i32 = arith.constant 0 : i32
    %0 = arith.cmpi eq, %arg1, %c0_i32 : i32
    %1 = arith.extui %0 : i1 to i32
    %c0_i32_0 = arith.constant 0 : i32
    %2 = arith.cmpi ne, %1, %c0_i32_0 : i32
    scf.if %2 {
      %c0_176 = arith.constant 0 : index
      %c0_177 = arith.constant 0 : index
      %c0_178 = arith.constant 0 : index
      %432 = vector.load %arg7[%c0_176, %c0_177, %c0_178] : memref<2x4x128xf32, #tpu.memory_space<vmem>>, vector<2x4x128xf32>
      %c0_179 = arith.constant 0 : index
      %c0_180 = arith.constant 0 : index
      %c0_181 = arith.constant 0 : index
      %433 = vector.load %arg11[%c0_179, %c0_180, %c0_181] : memref<2x4x128xf32, #tpu.memory_space<vmem>>, vector<2x4x128xf32>
      tpu.vector_store %arg11[%c0_179, %c0_180, %c0_181], %432 {strides = array<i32>} : memref<2x4x128xf32, #tpu.memory_space<vmem>>, vector<2x4x128xf32>,
    } else {
    }
    %c0 = arith.constant 0 : index
    %c0_1 = arith.constant 0 : index
    %c0_2 = arith.constant 0 : index
    %3 = vector.load %arg11[%c0, %c0_1, %c0_2] : memref<2x4x128xf32, #tpu.memory_space<vmem>>, vector<2x4x128xf32>
    %c0_3 = arith.constant 0 : index
    %c0_4 = arith.constant 0 : index
    %c0_5 = arith.constant 0 : index
    %c0_6 = arith.constant 0 : index
    %4 = vector.load %arg8[%c0_3, %c0_4, %c0_5, %c0_6] : memref<1x2x4x128xf32, #tpu.memory_space<vmem>>, vector<1x2x4x128xf32>
    %5 = vector.shape_cast %4 : vector<1x2x4x128xf32> to vector<2x4x128xf32>
    %6 = arith.index_cast %arg1 : i32 to index
    %c0_7 = arith.constant 0 : index
    %7 = memref.load %arg2[%6, %c0_7] : memref<3x8xf32, #tpu.memory_space<smem>>
    %8 = arith.index_cast %arg1 : i32 to index
    %c1 = arith.constant 1 : index
    %9 = memref.load %arg2[%8, %c1] : memref<3x8xf32, #tpu.memory_space<smem>>
    %10 = arith.index_cast %arg1 : i32 to index
    %c2 = arith.constant 2 : index
    %11 = memref.load %arg2[%10, %c2] : memref<3x8xf32, #tpu.memory_space<smem>>
    %12 = arith.index_cast %arg1 : i32 to index
    %c3 = arith.constant 3 : index
    %13 = memref.load %arg2[%12, %c3] : memref<3x8xf32, #tpu.memory_space<smem>>
    %14 = arith.index_cast %arg1 : i32 to index
    %c4 = arith.constant 4 : index
    %15 = memref.load %arg2[%14, %c4] : memref<3x8xf32, #tpu.memory_space<smem>>
    %16 = vector.extract_strided_slice %3 {offsets = [0, 0, 0], sizes = [1, 1, 128], strides = [1, 1, 1]} : vector<2x4x128xf32> to vector<1x1x128xf32>
    %17 = vector.shape_cast %16 : vector<1x1x128xf32> to vector<128xf32>
    %c0_8 = arith.constant 0 : index
    %c0_9 = arith.constant 0 : index
    %18 = memref.load %arg3[%c0_8, %c0_9] : memref<4x4xf32, #tpu.memory_space<smem>>
    %19 = vector.broadcast %18 : f32 to vector<128xf32>
    %20 = arith.mulf %17, %19 : vector<128xf32>
    %21 = vector.extract_strided_slice %3 {offsets = [0, 1, 0], sizes = [1, 1, 128], strides = [1, 1, 1]} : vector<2x4x128xf32> to vector<1x1x128xf32>
    %22 = vector.shape_cast %21 : vector<1x1x128xf32> to vector<128xf32>
    %c1_10 = arith.constant 1 : index
    %c0_11 = arith.constant 0 : index
    %23 = memref.load %arg3[%c1_10, %c0_11] : memref<4x4xf32, #tpu.memory_space<smem>>
    %24 = vector.broadcast %23 : f32 to vector<128xf32>
    %25 = arith.mulf %22, %24 : vector<128xf32>
    %26 = arith.addf %20, %25 : vector<128xf32>
    %27 = vector.extract_strided_slice %3 {offsets = [0, 2, 0], sizes = [1, 1, 128], strides = [1, 1, 1]} : vector<2x4x128xf32> to vector<1x1x128xf32>
    %28 = vector.shape_cast %27 : vector<1x1x128xf32> to vector<128xf32>
    %c2_12 = arith.constant 2 : index
    %c0_13 = arith.constant 0 : index
    %29 = memref.load %arg3[%c2_12, %c0_13] : memref<4x4xf32, #tpu.memory_space<smem>>
    %30 = vector.broadcast %29 : f32 to vector<128xf32>
    %31 = arith.mulf %28, %30 : vector<128xf32>
    %32 = arith.addf %26, %31 : vector<128xf32>
    %33 = vector.extract_strided_slice %3 {offsets = [0, 3, 0], sizes = [1, 1, 128], strides = [1, 1, 1]} : vector<2x4x128xf32> to vector<1x1x128xf32>
    %34 = vector.shape_cast %33 : vector<1x1x128xf32> to vector<128xf32>
    %c3_14 = arith.constant 3 : index
    %c0_15 = arith.constant 0 : index
    %35 = memref.load %arg3[%c3_14, %c0_15] : memref<4x4xf32, #tpu.memory_space<smem>>
    %36 = vector.broadcast %35 : f32 to vector<128xf32>
    %37 = arith.mulf %34, %36 : vector<128xf32>
    %38 = arith.addf %32, %37 : vector<128xf32>
    %c0_16 = arith.constant 0 : index
    %c0_17 = arith.constant 0 : index
    %39 = memref.load %arg4[%c0_16, %c0_17] : memref<2x4xf32, #tpu.memory_space<smem>>
    %40 = vector.broadcast %39 : f32 to vector<128xf32>
    %41 = arith.addf %38, %40 : vector<128xf32>
    %42 = vector.extract_strided_slice %3 {offsets = [0, 0, 0], sizes = [1, 1, 128], strides = [1, 1, 1]} : vector<2x4x128xf32> to vector<1x1x128xf32>
    %43 = vector.shape_cast %42 : vector<1x1x128xf32> to vector<128xf32>
    %44 = vector.broadcast %7 : f32 to vector<128xf32>
    %45 = arith.mulf %44, %43 : vector<128xf32>
    %46 = vector.broadcast %9 : f32 to vector<128xf32>
    %47 = arith.mulf %46, %41 : vector<128xf32>
    %48 = arith.subf %45, %47 : vector<128xf32>
    %49 = vector.broadcast %11 : f32 to vector<128xf32>
    %50 = arith.mulf %49, %43 : vector<128xf32>
    %51 = vector.broadcast %13 : f32 to vector<128xf32>
    %52 = arith.mulf %51, %41 : vector<128xf32>
    %53 = arith.addf %50, %52 : vector<128xf32>
    %54 = vector.extract_strided_slice %5 {offsets = [0, 0, 0], sizes = [1, 1, 128], strides = [1, 1, 1]} : vector<2x4x128xf32> to vector<1x1x128xf32>
    %55 = vector.shape_cast %54 : vector<1x1x128xf32> to vector<128xf32>
    %56 = vector.broadcast %15 : f32 to vector<128xf32>
    %57 = arith.mulf %56, %55 : vector<128xf32>
    %58 = arith.addf %53, %57 : vector<128xf32>
    %c0_18 = arith.constant 0 : index
    %c0_19 = arith.constant 0 : index
    %c0_20 = arith.constant 0 : index
    %59 = vector.load %arg11[%c0_18, %c0_19, %c0_20] : memref<2x4x128xf32, #tpu.memory_space<vmem>>, vector<1x1x128xf32>
    %60 = vector.shape_cast %59 : vector<1x1x128xf32> to vector<128xf32>
    %61 = vector.shape_cast %58 : vector<128xf32> to vector<1x1x128xf32>
    tpu.vector_store %arg11[%c0_18, %c0_19, %c0_20], %61 {strides = array<i32>} : memref<2x4x128xf32, #tpu.memory_space<vmem>>, vector<1x1x128xf32>,
    %c0_21 = arith.constant 0 : index
    %c0_22 = arith.constant 0 : index
    %c0_23 = arith.constant 0 : index
    %c0_24 = arith.constant 0 : index
    %62 = vector.load %arg9[%c0_21, %c0_22, %c0_23, %c0_24] : memref<1x2x4x128xf32, #tpu.memory_space<vmem>>, vector<1x1x1x128xf32>
    %63 = vector.shape_cast %62 : vector<1x1x1x128xf32> to vector<128xf32>
    %64 = vector.shape_cast %58 : vector<128xf32> to vector<1x1x1x128xf32>
    tpu.vector_store %arg9[%c0_21, %c0_22, %c0_23, %c0_24], %64 {strides = array<i32>} : memref<1x2x4x128xf32, #tpu.memory_space<vmem>>, vector<1x1x1x128xf32>,
    %c0_25 = arith.constant 0 : index
    %c0_26 = arith.constant 0 : index
    %c0_27 = arith.constant 0 : index
    %c0_28 = arith.constant 0 : index
    %65 = vector.load %arg10[%c0_25, %c0_26, %c0_27, %c0_28] : memref<1x2x4x128xf32, #tpu.memory_space<vmem>>, vector<1x1x1x128xf32>
    %66 = vector.shape_cast %65 : vector<1x1x1x128xf32> to vector<128xf32>
    %67 = vector.shape_cast %48 : vector<128xf32> to vector<1x1x1x128xf32>
    tpu.vector_store %arg10[%c0_25, %c0_26, %c0_27, %c0_28], %67 {strides = array<i32>} : memref<1x2x4x128xf32, #tpu.memory_space<vmem>>, vector<1x1x1x128xf32>,
    %68 = vector.extract_strided_slice %3 {offsets = [0, 0, 0], sizes = [1, 1, 128], strides = [1, 1, 1]} : vector<2x4x128xf32> to vector<1x1x128xf32>
    %69 = vector.shape_cast %68 : vector<1x1x128xf32> to vector<128xf32>
    %c0_29 = arith.constant 0 : index
    %c1_30 = arith.constant 1 : index
    %70 = memref.load %arg3[%c0_29, %c1_30] : memref<4x4xf32, #tpu.memory_space<smem>>
    %71 = vector.broadcast %70 : f32 to vector<128xf32>
    %72 = arith.mulf %69, %71 : vector<128xf32>
    %73 = vector.extract_strided_slice %3 {offsets = [0, 1, 0], sizes = [1, 1, 128], strides = [1, 1, 1]} : vector<2x4x128xf32> to vector<1x1x128xf32>
    %74 = vector.shape_cast %73 : vector<1x1x128xf32> to vector<128xf32>
    %c1_31 = arith.constant 1 : index
    %c1_32 = arith.constant 1 : index
    %75 = memref.load %arg3[%c1_31, %c1_32] : memref<4x4xf32, #tpu.memory_space<smem>>
    %76 = vector.broadcast %75 : f32 to vector<128xf32>
    %77 = arith.mulf %74, %76 : vector<128xf32>
    %78 = arith.addf %72, %77 : vector<128xf32>
    %79 = vector.extract_strided_slice %3 {offsets = [0, 2, 0], sizes = [1, 1, 128], strides = [1, 1, 1]} : vector<2x4x128xf32> to vector<1x1x128xf32>
    %80 = vector.shape_cast %79 : vector<1x1x128xf32> to vector<128xf32>
    %c2_33 = arith.constant 2 : index
    %c1_34 = arith.constant 1 : index
    %81 = memref.load %arg3[%c2_33, %c1_34] : memref<4x4xf32, #tpu.memory_space<smem>>
    %82 = vector.broadcast %81 : f32 to vector<128xf32>
    %83 = arith.mulf %80, %82 : vector<128xf32>
    %84 = arith.addf %78, %83 : vector<128xf32>
    %85 = vector.extract_strided_slice %3 {offsets = [0, 3, 0], sizes = [1, 1, 128], strides = [1, 1, 1]} : vector<2x4x128xf32> to vector<1x1x128xf32>
    %86 = vector.shape_cast %85 : vector<1x1x128xf32> to vector<128xf32>
    %c3_35 = arith.constant 3 : index
    %c1_36 = arith.constant 1 : index
    %87 = memref.load %arg3[%c3_35, %c1_36] : memref<4x4xf32, #tpu.memory_space<smem>>
    %88 = vector.broadcast %87 : f32 to vector<128xf32>
    %89 = arith.mulf %86, %88 : vector<128xf32>
    %90 = arith.addf %84, %89 : vector<128xf32>
    %c0_37 = arith.constant 0 : index
    %c1_38 = arith.constant 1 : index
    %91 = memref.load %arg4[%c0_37, %c1_38] : memref<2x4xf32, #tpu.memory_space<smem>>
    %92 = vector.broadcast %91 : f32 to vector<128xf32>
    %93 = arith.addf %90, %92 : vector<128xf32>
    %94 = vector.extract_strided_slice %3 {offsets = [0, 1, 0], sizes = [1, 1, 128], strides = [1, 1, 1]} : vector<2x4x128xf32> to vector<1x1x128xf32>
    %95 = vector.shape_cast %94 : vector<1x1x128xf32> to vector<128xf32>
    %96 = vector.broadcast %7 : f32 to vector<128xf32>
    %97 = arith.mulf %96, %95 : vector<128xf32>
    %98 = vector.broadcast %9 : f32 to vector<128xf32>
    %99 = arith.mulf %98, %93 : vector<128xf32>
    %100 = arith.subf %97, %99 : vector<128xf32>
    %101 = vector.broadcast %11 : f32 to vector<128xf32>
    %102 = arith.mulf %101, %95 : vector<128xf32>
    %103 = vector.broadcast %13 : f32 to vector<128xf32>
    %104 = arith.mulf %103, %93 : vector<128xf32>
    %105 = arith.addf %102, %104 : vector<128xf32>
    %106 = vector.extract_strided_slice %5 {offsets = [0, 1, 0], sizes = [1, 1, 128], strides = [1, 1, 1]} : vector<2x4x128xf32> to vector<1x1x128xf32>
    %107 = vector.shape_cast %106 : vector<1x1x128xf32> to vector<128xf32>
    %108 = vector.broadcast %15 : f32 to vector<128xf32>
    %109 = arith.mulf %108, %107 : vector<128xf32>
    %110 = arith.addf %105, %109 : vector<128xf32>
    %c0_39 = arith.constant 0 : index
    %c1_40 = arith.constant 1 : index
    %c0_41 = arith.constant 0 : index
    %111 = vector.load %arg11[%c0_39, %c1_40, %c0_41] : memref<2x4x128xf32, #tpu.memory_space<vmem>>, vector<1x1x128xf32>
    %112 = vector.shape_cast %111 : vector<1x1x128xf32> to vector<128xf32>
    %113 = vector.shape_cast %110 : vector<128xf32> to vector<1x1x128xf32>
    tpu.vector_store %arg11[%c0_39, %c1_40, %c0_41], %113 {strides = array<i32>} : memref<2x4x128xf32, #tpu.memory_space<vmem>>, vector<1x1x128xf32>,
    %c0_42 = arith.constant 0 : index
    %c0_43 = arith.constant 0 : index
    %c1_44 = arith.constant 1 : index
    %c0_45 = arith.constant 0 : index
    %114 = vector.load %arg9[%c0_42, %c0_43, %c1_44, %c0_45] : memref<1x2x4x128xf32, #tpu.memory_space<vmem>>, vector<1x1x1x128xf32>
    %115 = vector.shape_cast %114 : vector<1x1x1x128xf32> to vector<128xf32>
    %116 = vector.shape_cast %110 : vector<128xf32> to vector<1x1x1x128xf32>
    tpu.vector_store %arg9[%c0_42, %c0_43, %c1_44, %c0_45], %116 {strides = array<i32>} : memref<1x2x4x128xf32, #tpu.memory_space<vmem>>, vector<1x1x1x128xf32>,
    %c0_46 = arith.constant 0 : index
    %c0_47 = arith.constant 0 : index
    %c1_48 = arith.constant 1 : index
    %c0_49 = arith.constant 0 : index
    %117 = vector.load %arg10[%c0_46, %c0_47, %c1_48, %c0_49] : memref<1x2x4x128xf32, #tpu.memory_space<vmem>>, vector<1x1x1x128xf32>
    %118 = vector.shape_cast %117 : vector<1x1x1x128xf32> to vector<128xf32>
    %119 = vector.shape_cast %100 : vector<128xf32> to vector<1x1x1x128xf32>
    tpu.vector_store %arg10[%c0_46, %c0_47, %c1_48, %c0_49], %119 {strides = array<i32>} : memref<1x2x4x128xf32, #tpu.memory_space<vmem>>, vector<1x1x1x128xf32>,
    %120 = vector.extract_strided_slice %3 {offsets = [0, 0, 0], sizes = [1, 1, 128], strides = [1, 1, 1]} : vector<2x4x128xf32> to vector<1x1x128xf32>
    %121 = vector.shape_cast %120 : vector<1x1x128xf32> to vector<128xf32>
    %c0_50 = arith.constant 0 : index
    %c2_51 = arith.constant 2 : index
    %122 = memref.load %arg3[%c0_50, %c2_51] : memref<4x4xf32, #tpu.memory_space<smem>>
    %123 = vector.broadcast %122 : f32 to vector<128xf32>
    %124 = arith.mulf %121, %123 : vector<128xf32>
    %125 = vector.extract_strided_slice %3 {offsets = [0, 1, 0], sizes = [1, 1, 128], strides = [1, 1, 1]} : vector<2x4x128xf32> to vector<1x1x128xf32>
    %126 = vector.shape_cast %125 : vector<1x1x128xf32> to vector<128xf32>
    %c1_52 = arith.constant 1 : index
    %c2_53 = arith.constant 2 : index
    %127 = memref.load %arg3[%c1_52, %c2_53] : memref<4x4xf32, #tpu.memory_space<smem>>
    %128 = vector.broadcast %127 : f32 to vector<128xf32>
    %129 = arith.mulf %126, %128 : vector<128xf32>
    %130 = arith.addf %124, %129 : vector<128xf32>
    %131 = vector.extract_strided_slice %3 {offsets = [0, 2, 0], sizes = [1, 1, 128], strides = [1, 1, 1]} : vector<2x4x128xf32> to vector<1x1x128xf32>
    %132 = vector.shape_cast %131 : vector<1x1x128xf32> to vector<128xf32>
    %c2_54 = arith.constant 2 : index
    %c2_55 = arith.constant 2 : index
    %133 = memref.load %arg3[%c2_54, %c2_55] : memref<4x4xf32, #tpu.memory_space<smem>>
    %134 = vector.broadcast %133 : f32 to vector<128xf32>
    %135 = arith.mulf %132, %134 : vector<128xf32>
    %136 = arith.addf %130, %135 : vector<128xf32>
    %137 = vector.extract_strided_slice %3 {offsets = [0, 3, 0], sizes = [1, 1, 128], strides = [1, 1, 1]} : vector<2x4x128xf32> to vector<1x1x128xf32>
    %138 = vector.shape_cast %137 : vector<1x1x128xf32> to vector<128xf32>
    %c3_56 = arith.constant 3 : index
    %c2_57 = arith.constant 2 : index
    %139 = memref.load %arg3[%c3_56, %c2_57] : memref<4x4xf32, #tpu.memory_space<smem>>
    %140 = vector.broadcast %139 : f32 to vector<128xf32>
    %141 = arith.mulf %138, %140 : vector<128xf32>
    %142 = arith.addf %136, %141 : vector<128xf32>
    %c0_58 = arith.constant 0 : index
    %c2_59 = arith.constant 2 : index
    %143 = memref.load %arg4[%c0_58, %c2_59] : memref<2x4xf32, #tpu.memory_space<smem>>
    %144 = vector.broadcast %143 : f32 to vector<128xf32>
    %145 = arith.addf %142, %144 : vector<128xf32>
    %146 = vector.extract_strided_slice %3 {offsets = [0, 2, 0], sizes = [1, 1, 128], strides = [1, 1, 1]} : vector<2x4x128xf32> to vector<1x1x128xf32>
    %147 = vector.shape_cast %146 : vector<1x1x128xf32> to vector<128xf32>
    %148 = vector.broadcast %7 : f32 to vector<128xf32>
    %149 = arith.mulf %148, %147 : vector<128xf32>
    %150 = vector.broadcast %9 : f32 to vector<128xf32>
    %151 = arith.mulf %150, %145 : vector<128xf32>
    %152 = arith.subf %149, %151 : vector<128xf32>
    %153 = vector.broadcast %11 : f32 to vector<128xf32>
    %154 = arith.mulf %153, %147 : vector<128xf32>
    %155 = vector.broadcast %13 : f32 to vector<128xf32>
    %156 = arith.mulf %155, %145 : vector<128xf32>
    %157 = arith.addf %154, %156 : vector<128xf32>
    %158 = vector.extract_strided_slice %5 {offsets = [0, 2, 0], sizes = [1, 1, 128], strides = [1, 1, 1]} : vector<2x4x128xf32> to vector<1x1x128xf32>
    %159 = vector.shape_cast %158 : vector<1x1x128xf32> to vector<128xf32>
    %160 = vector.broadcast %15 : f32 to vector<128xf32>
    %161 = arith.mulf %160, %159 : vector<128xf32>
    %162 = arith.addf %157, %161 : vector<128xf32>
    %c0_60 = arith.constant 0 : index
    %c2_61 = arith.constant 2 : index
    %c0_62 = arith.constant 0 : index
    %163 = vector.load %arg11[%c0_60, %c2_61, %c0_62] : memref<2x4x128xf32, #tpu.memory_space<vmem>>, vector<1x1x128xf32>
    %164 = vector.shape_cast %163 : vector<1x1x128xf32> to vector<128xf32>
    %165 = vector.shape_cast %162 : vector<128xf32> to vector<1x1x128xf32>
    tpu.vector_store %arg11[%c0_60, %c2_61, %c0_62], %165 {strides = array<i32>} : memref<2x4x128xf32, #tpu.memory_space<vmem>>, vector<1x1x128xf32>,
    %c0_63 = arith.constant 0 : index
    %c0_64 = arith.constant 0 : index
    %c2_65 = arith.constant 2 : index
    %c0_66 = arith.constant 0 : index
    %166 = vector.load %arg9[%c0_63, %c0_64, %c2_65, %c0_66] : memref<1x2x4x128xf32, #tpu.memory_space<vmem>>, vector<1x1x1x128xf32>
    %167 = vector.shape_cast %166 : vector<1x1x1x128xf32> to vector<128xf32>
    %168 = vector.shape_cast %162 : vector<128xf32> to vector<1x1x1x128xf32>
    tpu.vector_store %arg9[%c0_63, %c0_64, %c2_65, %c0_66], %168 {strides = array<i32>} : memref<1x2x4x128xf32, #tpu.memory_space<vmem>>, vector<1x1x1x128xf32>,
    %c0_67 = arith.constant 0 : index
    %c0_68 = arith.constant 0 : index
    %c2_69 = arith.constant 2 : index
    %c0_70 = arith.constant 0 : index
    %169 = vector.load %arg10[%c0_67, %c0_68, %c2_69, %c0_70] : memref<1x2x4x128xf32, #tpu.memory_space<vmem>>, vector<1x1x1x128xf32>
    %170 = vector.shape_cast %169 : vector<1x1x1x128xf32> to vector<128xf32>
    %171 = vector.shape_cast %152 : vector<128xf32> to vector<1x1x1x128xf32>
    tpu.vector_store %arg10[%c0_67, %c0_68, %c2_69, %c0_70], %171 {strides = array<i32>} : memref<1x2x4x128xf32, #tpu.memory_space<vmem>>, vector<1x1x1x128xf32>,
    %172 = vector.extract_strided_slice %3 {offsets = [0, 0, 0], sizes = [1, 1, 128], strides = [1, 1, 1]} : vector<2x4x128xf32> to vector<1x1x128xf32>
    %173 = vector.shape_cast %172 : vector<1x1x128xf32> to vector<128xf32>
    %c0_71 = arith.constant 0 : index
    %c3_72 = arith.constant 3 : index
    %174 = memref.load %arg3[%c0_71, %c3_72] : memref<4x4xf32, #tpu.memory_space<smem>>
    %175 = vector.broadcast %174 : f32 to vector<128xf32>
    %176 = arith.mulf %173, %175 : vector<128xf32>
    %177 = vector.extract_strided_slice %3 {offsets = [0, 1, 0], sizes = [1, 1, 128], strides = [1, 1, 1]} : vector<2x4x128xf32> to vector<1x1x128xf32>
    %178 = vector.shape_cast %177 : vector<1x1x128xf32> to vector<128xf32>
    %c1_73 = arith.constant 1 : index
    %c3_74 = arith.constant 3 : index
    %179 = memref.load %arg3[%c1_73, %c3_74] : memref<4x4xf32, #tpu.memory_space<smem>>
    %180 = vector.broadcast %179 : f32 to vector<128xf32>
    %181 = arith.mulf %178, %180 : vector<128xf32>
    %182 = arith.addf %176, %181 : vector<128xf32>
    %183 = vector.extract_strided_slice %3 {offsets = [0, 2, 0], sizes = [1, 1, 128], strides = [1, 1, 1]} : vector<2x4x128xf32> to vector<1x1x128xf32>
    %184 = vector.shape_cast %183 : vector<1x1x128xf32> to vector<128xf32>
    %c2_75 = arith.constant 2 : index
    %c3_76 = arith.constant 3 : index
    %185 = memref.load %arg3[%c2_75, %c3_76] : memref<4x4xf32, #tpu.memory_space<smem>>
    %186 = vector.broadcast %185 : f32 to vector<128xf32>
    %187 = arith.mulf %184, %186 : vector<128xf32>
    %188 = arith.addf %182, %187 : vector<128xf32>
    %189 = vector.extract_strided_slice %3 {offsets = [0, 3, 0], sizes = [1, 1, 128], strides = [1, 1, 1]} : vector<2x4x128xf32> to vector<1x1x128xf32>
    %190 = vector.shape_cast %189 : vector<1x1x128xf32> to vector<128xf32>
    %c3_77 = arith.constant 3 : index
    %c3_78 = arith.constant 3 : index
    %191 = memref.load %arg3[%c3_77, %c3_78] : memref<4x4xf32, #tpu.memory_space<smem>>
    %192 = vector.broadcast %191 : f32 to vector<128xf32>
    %193 = arith.mulf %190, %192 : vector<128xf32>
    %194 = arith.addf %188, %193 : vector<128xf32>
    %c0_79 = arith.constant 0 : index
    %c3_80 = arith.constant 3 : index
    %195 = memref.load %arg4[%c0_79, %c3_80] : memref<2x4xf32, #tpu.memory_space<smem>>
    %196 = vector.broadcast %195 : f32 to vector<128xf32>
    %197 = arith.addf %194, %196 : vector<128xf32>
    %198 = vector.extract_strided_slice %3 {offsets = [0, 3, 0], sizes = [1, 1, 128], strides = [1, 1, 1]} : vector<2x4x128xf32> to vector<1x1x128xf32>
    %199 = vector.shape_cast %198 : vector<1x1x128xf32> to vector<128xf32>
    %200 = vector.broadcast %7 : f32 to vector<128xf32>
    %201 = arith.mulf %200, %199 : vector<128xf32>
    %202 = vector.broadcast %9 : f32 to vector<128xf32>
    %203 = arith.mulf %202, %197 : vector<128xf32>
    %204 = arith.subf %201, %203 : vector<128xf32>
    %205 = vector.broadcast %11 : f32 to vector<128xf32>
    %206 = arith.mulf %205, %199 : vector<128xf32>
    %207 = vector.broadcast %13 : f32 to vector<128xf32>
    %208 = arith.mulf %207, %197 : vector<128xf32>
    %209 = arith.addf %206, %208 : vector<128xf32>
    %210 = vector.extract_strided_slice %5 {offsets = [0, 3, 0], sizes = [1, 1, 128], strides = [1, 1, 1]} : vector<2x4x128xf32> to vector<1x1x128xf32>
    %211 = vector.shape_cast %210 : vector<1x1x128xf32> to vector<128xf32>
    %212 = vector.broadcast %15 : f32 to vector<128xf32>
    %213 = arith.mulf %212, %211 : vector<128xf32>
    %214 = arith.addf %209, %213 : vector<128xf32>
    %c0_81 = arith.constant 0 : index
    %c3_82 = arith.constant 3 : index
    %c0_83 = arith.constant 0 : index
    %215 = vector.load %arg11[%c0_81, %c3_82, %c0_83] : memref<2x4x128xf32, #tpu.memory_space<vmem>>, vector<1x1x128xf32>
    %216 = vector.shape_cast %215 : vector<1x1x128xf32> to vector<128xf32>
    %217 = vector.shape_cast %214 : vector<128xf32> to vector<1x1x128xf32>
    tpu.vector_store %arg11[%c0_81, %c3_82, %c0_83], %217 {strides = array<i32>} : memref<2x4x128xf32, #tpu.memory_space<vmem>>, vector<1x1x128xf32>,
    %c0_84 = arith.constant 0 : index
    %c0_85 = arith.constant 0 : index
    %c3_86 = arith.constant 3 : index
    %c0_87 = arith.constant 0 : index
    %218 = vector.load %arg9[%c0_84, %c0_85, %c3_86, %c0_87] : memref<1x2x4x128xf32, #tpu.memory_space<vmem>>, vector<1x1x1x128xf32>
    %219 = vector.shape_cast %218 : vector<1x1x1x128xf32> to vector<128xf32>
    %220 = vector.shape_cast %214 : vector<128xf32> to vector<1x1x1x128xf32>
    tpu.vector_store %arg9[%c0_84, %c0_85, %c3_86, %c0_87], %220 {strides = array<i32>} : memref<1x2x4x128xf32, #tpu.memory_space<vmem>>, vector<1x1x1x128xf32>,
    %c0_88 = arith.constant 0 : index
    %c0_89 = arith.constant 0 : index
    %c3_90 = arith.constant 3 : index
    %c0_91 = arith.constant 0 : index
    %221 = vector.load %arg10[%c0_88, %c0_89, %c3_90, %c0_91] : memref<1x2x4x128xf32, #tpu.memory_space<vmem>>, vector<1x1x1x128xf32>
    %222 = vector.shape_cast %221 : vector<1x1x1x128xf32> to vector<128xf32>
    %223 = vector.shape_cast %204 : vector<128xf32> to vector<1x1x1x128xf32>
    tpu.vector_store %arg10[%c0_88, %c0_89, %c3_90, %c0_91], %223 {strides = array<i32>} : memref<1x2x4x128xf32, #tpu.memory_space<vmem>>, vector<1x1x1x128xf32>,
    %224 = vector.extract_strided_slice %3 {offsets = [1, 0, 0], sizes = [1, 1, 128], strides = [1, 1, 1]} : vector<2x4x128xf32> to vector<1x1x128xf32>
    %225 = vector.shape_cast %224 : vector<1x1x128xf32> to vector<128xf32>
    %c0_92 = arith.constant 0 : index
    %c0_93 = arith.constant 0 : index
    %226 = memref.load %arg3[%c0_92, %c0_93] : memref<4x4xf32, #tpu.memory_space<smem>>
    %227 = vector.broadcast %226 : f32 to vector<128xf32>
    %228 = arith.mulf %225, %227 : vector<128xf32>
    %229 = vector.extract_strided_slice %3 {offsets = [1, 1, 0], sizes = [1, 1, 128], strides = [1, 1, 1]} : vector<2x4x128xf32> to vector<1x1x128xf32>
    %230 = vector.shape_cast %229 : vector<1x1x128xf32> to vector<128xf32>
    %c1_94 = arith.constant 1 : index
    %c0_95 = arith.constant 0 : index
    %231 = memref.load %arg3[%c1_94, %c0_95] : memref<4x4xf32, #tpu.memory_space<smem>>
    %232 = vector.broadcast %231 : f32 to vector<128xf32>
    %233 = arith.mulf %230, %232 : vector<128xf32>
    %234 = arith.addf %228, %233 : vector<128xf32>
    %235 = vector.extract_strided_slice %3 {offsets = [1, 2, 0], sizes = [1, 1, 128], strides = [1, 1, 1]} : vector<2x4x128xf32> to vector<1x1x128xf32>
    %236 = vector.shape_cast %235 : vector<1x1x128xf32> to vector<128xf32>
    %c2_96 = arith.constant 2 : index
    %c0_97 = arith.constant 0 : index
    %237 = memref.load %arg3[%c2_96, %c0_97] : memref<4x4xf32, #tpu.memory_space<smem>>
    %238 = vector.broadcast %237 : f32 to vector<128xf32>
    %239 = arith.mulf %236, %238 : vector<128xf32>
    %240 = arith.addf %234, %239 : vector<128xf32>
    %241 = vector.extract_strided_slice %3 {offsets = [1, 3, 0], sizes = [1, 1, 128], strides = [1, 1, 1]} : vector<2x4x128xf32> to vector<1x1x128xf32>
    %242 = vector.shape_cast %241 : vector<1x1x128xf32> to vector<128xf32>
    %c3_98 = arith.constant 3 : index
    %c0_99 = arith.constant 0 : index
    %243 = memref.load %arg3[%c3_98, %c0_99] : memref<4x4xf32, #tpu.memory_space<smem>>
    %244 = vector.broadcast %243 : f32 to vector<128xf32>
    %245 = arith.mulf %242, %244 : vector<128xf32>
    %246 = arith.addf %240, %245 : vector<128xf32>
    %c1_100 = arith.constant 1 : index
    %c0_101 = arith.constant 0 : index
    %247 = memref.load %arg4[%c1_100, %c0_101] : memref<2x4xf32, #tpu.memory_space<smem>>
    %248 = vector.broadcast %247 : f32 to vector<128xf32>
    %249 = arith.addf %246, %248 : vector<128xf32>
    %250 = vector.extract_strided_slice %3 {offsets = [1, 0, 0], sizes = [1, 1, 128], strides = [1, 1, 1]} : vector<2x4x128xf32> to vector<1x1x128xf32>
    %251 = vector.shape_cast %250 : vector<1x1x128xf32> to vector<128xf32>
    %252 = vector.broadcast %7 : f32 to vector<128xf32>
    %253 = arith.mulf %252, %251 : vector<128xf32>
    %254 = vector.broadcast %9 : f32 to vector<128xf32>
    %255 = arith.mulf %254, %249 : vector<128xf32>
    %256 = arith.subf %253, %255 : vector<128xf32>
    %257 = vector.broadcast %11 : f32 to vector<128xf32>
    %258 = arith.mulf %257, %251 : vector<128xf32>
    %259 = vector.broadcast %13 : f32 to vector<128xf32>
    %260 = arith.mulf %259, %249 : vector<128xf32>
    %261 = arith.addf %258, %260 : vector<128xf32>
    %262 = vector.extract_strided_slice %5 {offsets = [1, 0, 0], sizes = [1, 1, 128], strides = [1, 1, 1]} : vector<2x4x128xf32> to vector<1x1x128xf32>
    %263 = vector.shape_cast %262 : vector<1x1x128xf32> to vector<128xf32>
    %264 = vector.broadcast %15 : f32 to vector<128xf32>
    %265 = arith.mulf %264, %263 : vector<128xf32>
    %266 = arith.addf %261, %265 : vector<128xf32>
    %c1_102 = arith.constant 1 : index
    %c0_103 = arith.constant 0 : index
    %c0_104 = arith.constant 0 : index
    %267 = vector.load %arg11[%c1_102, %c0_103, %c0_104] : memref<2x4x128xf32, #tpu.memory_space<vmem>>, vector<1x1x128xf32>
    %268 = vector.shape_cast %267 : vector<1x1x128xf32> to vector<128xf32>
    %269 = vector.shape_cast %266 : vector<128xf32> to vector<1x1x128xf32>
    tpu.vector_store %arg11[%c1_102, %c0_103, %c0_104], %269 {strides = array<i32>} : memref<2x4x128xf32, #tpu.memory_space<vmem>>, vector<1x1x128xf32>,
    %c0_105 = arith.constant 0 : index
    %c1_106 = arith.constant 1 : index
    %c0_107 = arith.constant 0 : index
    %c0_108 = arith.constant 0 : index
    %270 = vector.load %arg9[%c0_105, %c1_106, %c0_107, %c0_108] : memref<1x2x4x128xf32, #tpu.memory_space<vmem>>, vector<1x1x1x128xf32>
    %271 = vector.shape_cast %270 : vector<1x1x1x128xf32> to vector<128xf32>
    %272 = vector.shape_cast %266 : vector<128xf32> to vector<1x1x1x128xf32>
    tpu.vector_store %arg9[%c0_105, %c1_106, %c0_107, %c0_108], %272 {strides = array<i32>} : memref<1x2x4x128xf32, #tpu.memory_space<vmem>>, vector<1x1x1x128xf32>,
    %c0_109 = arith.constant 0 : index
    %c1_110 = arith.constant 1 : index
    %c0_111 = arith.constant 0 : index
    %c0_112 = arith.constant 0 : index
    %273 = vector.load %arg10[%c0_109, %c1_110, %c0_111, %c0_112] : memref<1x2x4x128xf32, #tpu.memory_space<vmem>>, vector<1x1x1x128xf32>
    %274 = vector.shape_cast %273 : vector<1x1x1x128xf32> to vector<128xf32>
    %275 = vector.shape_cast %256 : vector<128xf32> to vector<1x1x1x128xf32>
    tpu.vector_store %arg10[%c0_109, %c1_110, %c0_111, %c0_112], %275 {strides = array<i32>} : memref<1x2x4x128xf32, #tpu.memory_space<vmem>>, vector<1x1x1x128xf32>,
    %276 = vector.extract_strided_slice %3 {offsets = [1, 0, 0], sizes = [1, 1, 128], strides = [1, 1, 1]} : vector<2x4x128xf32> to vector<1x1x128xf32>
    %277 = vector.shape_cast %276 : vector<1x1x128xf32> to vector<128xf32>
    %c0_113 = arith.constant 0 : index
    %c1_114 = arith.constant 1 : index
    %278 = memref.load %arg3[%c0_113, %c1_114] : memref<4x4xf32, #tpu.memory_space<smem>>
    %279 = vector.broadcast %278 : f32 to vector<128xf32>
    %280 = arith.mulf %277, %279 : vector<128xf32>
    %281 = vector.extract_strided_slice %3 {offsets = [1, 1, 0], sizes = [1, 1, 128], strides = [1, 1, 1]} : vector<2x4x128xf32> to vector<1x1x128xf32>
    %282 = vector.shape_cast %281 : vector<1x1x128xf32> to vector<128xf32>
    %c1_115 = arith.constant 1 : index
    %c1_116 = arith.constant 1 : index
    %283 = memref.load %arg3[%c1_115, %c1_116] : memref<4x4xf32, #tpu.memory_space<smem>>
    %284 = vector.broadcast %283 : f32 to vector<128xf32>
    %285 = arith.mulf %282, %284 : vector<128xf32>
    %286 = arith.addf %280, %285 : vector<128xf32>
    %287 = vector.extract_strided_slice %3 {offsets = [1, 2, 0], sizes = [1, 1, 128], strides = [1, 1, 1]} : vector<2x4x128xf32> to vector<1x1x128xf32>
    %288 = vector.shape_cast %287 : vector<1x1x128xf32> to vector<128xf32>
    %c2_117 = arith.constant 2 : index
    %c1_118 = arith.constant 1 : index
    %289 = memref.load %arg3[%c2_117, %c1_118] : memref<4x4xf32, #tpu.memory_space<smem>>
    %290 = vector.broadcast %289 : f32 to vector<128xf32>
    %291 = arith.mulf %288, %290 : vector<128xf32>
    %292 = arith.addf %286, %291 : vector<128xf32>
    %293 = vector.extract_strided_slice %3 {offsets = [1, 3, 0], sizes = [1, 1, 128], strides = [1, 1, 1]} : vector<2x4x128xf32> to vector<1x1x128xf32>
    %294 = vector.shape_cast %293 : vector<1x1x128xf32> to vector<128xf32>
    %c3_119 = arith.constant 3 : index
    %c1_120 = arith.constant 1 : index
    %295 = memref.load %arg3[%c3_119, %c1_120] : memref<4x4xf32, #tpu.memory_space<smem>>
    %296 = vector.broadcast %295 : f32 to vector<128xf32>
    %297 = arith.mulf %294, %296 : vector<128xf32>
    %298 = arith.addf %292, %297 : vector<128xf32>
    %c1_121 = arith.constant 1 : index
    %c1_122 = arith.constant 1 : index
    %299 = memref.load %arg4[%c1_121, %c1_122] : memref<2x4xf32, #tpu.memory_space<smem>>
    %300 = vector.broadcast %299 : f32 to vector<128xf32>
    %301 = arith.addf %298, %300 : vector<128xf32>
    %302 = vector.extract_strided_slice %3 {offsets = [1, 1, 0], sizes = [1, 1, 128], strides = [1, 1, 1]} : vector<2x4x128xf32> to vector<1x1x128xf32>
    %303 = vector.shape_cast %302 : vector<1x1x128xf32> to vector<128xf32>
    %304 = vector.broadcast %7 : f32 to vector<128xf32>
    %305 = arith.mulf %304, %303 : vector<128xf32>
    %306 = vector.broadcast %9 : f32 to vector<128xf32>
    %307 = arith.mulf %306, %301 : vector<128xf32>
    %308 = arith.subf %305, %307 : vector<128xf32>
    %309 = vector.broadcast %11 : f32 to vector<128xf32>
    %310 = arith.mulf %309, %303 : vector<128xf32>
    %311 = vector.broadcast %13 : f32 to vector<128xf32>
    %312 = arith.mulf %311, %301 : vector<128xf32>
    %313 = arith.addf %310, %312 : vector<128xf32>
    %314 = vector.extract_strided_slice %5 {offsets = [1, 1, 0], sizes = [1, 1, 128], strides = [1, 1, 1]} : vector<2x4x128xf32> to vector<1x1x128xf32>
    %315 = vector.shape_cast %314 : vector<1x1x128xf32> to vector<128xf32>
    %316 = vector.broadcast %15 : f32 to vector<128xf32>
    %317 = arith.mulf %316, %315 : vector<128xf32>
    %318 = arith.addf %313, %317 : vector<128xf32>
    %c1_123 = arith.constant 1 : index
    %c1_124 = arith.constant 1 : index
    %c0_125 = arith.constant 0 : index
    %319 = vector.load %arg11[%c1_123, %c1_124, %c0_125] : memref<2x4x128xf32, #tpu.memory_space<vmem>>, vector<1x1x128xf32>
    %320 = vector.shape_cast %319 : vector<1x1x128xf32> to vector<128xf32>
    %321 = vector.shape_cast %318 : vector<128xf32> to vector<1x1x128xf32>
    tpu.vector_store %arg11[%c1_123, %c1_124, %c0_125], %321 {strides = array<i32>} : memref<2x4x128xf32, #tpu.memory_space<vmem>>, vector<1x1x128xf32>,
    %c0_126 = arith.constant 0 : index
    %c1_127 = arith.constant 1 : index
    %c1_128 = arith.constant 1 : index
    %c0_129 = arith.constant 0 : index
    %322 = vector.load %arg9[%c0_126, %c1_127, %c1_128, %c0_129] : memref<1x2x4x128xf32, #tpu.memory_space<vmem>>, vector<1x1x1x128xf32>
    %323 = vector.shape_cast %322 : vector<1x1x1x128xf32> to vector<128xf32>
    %324 = vector.shape_cast %318 : vector<128xf32> to vector<1x1x1x128xf32>
    tpu.vector_store %arg9[%c0_126, %c1_127, %c1_128, %c0_129], %324 {strides = array<i32>} : memref<1x2x4x128xf32, #tpu.memory_space<vmem>>, vector<1x1x1x128xf32>,
    %c0_130 = arith.constant 0 : index
    %c1_131 = arith.constant 1 : index
    %c1_132 = arith.constant 1 : index
    %c0_133 = arith.constant 0 : index
    %325 = vector.load %arg10[%c0_130, %c1_131, %c1_132, %c0_133] : memref<1x2x4x128xf32, #tpu.memory_space<vmem>>, vector<1x1x1x128xf32>
    %326 = vector.shape_cast %325 : vector<1x1x1x128xf32> to vector<128xf32>
    %327 = vector.shape_cast %308 : vector<128xf32> to vector<1x1x1x128xf32>
    tpu.vector_store %arg10[%c0_130, %c1_131, %c1_132, %c0_133], %327 {strides = array<i32>} : memref<1x2x4x128xf32, #tpu.memory_space<vmem>>, vector<1x1x1x128xf32>,
    %328 = vector.extract_strided_slice %3 {offsets = [1, 0, 0], sizes = [1, 1, 128], strides = [1, 1, 1]} : vector<2x4x128xf32> to vector<1x1x128xf32>
    %329 = vector.shape_cast %328 : vector<1x1x128xf32> to vector<128xf32>
    %c0_134 = arith.constant 0 : index
    %c2_135 = arith.constant 2 : index
    %330 = memref.load %arg3[%c0_134, %c2_135] : memref<4x4xf32, #tpu.memory_space<smem>>
    %331 = vector.broadcast %330 : f32 to vector<128xf32>
    %332 = arith.mulf %329, %331 : vector<128xf32>
    %333 = vector.extract_strided_slice %3 {offsets = [1, 1, 0], sizes = [1, 1, 128], strides = [1, 1, 1]} : vector<2x4x128xf32> to vector<1x1x128xf32>
    %334 = vector.shape_cast %333 : vector<1x1x128xf32> to vector<128xf32>
    %c1_136 = arith.constant 1 : index
    %c2_137 = arith.constant 2 : index
    %335 = memref.load %arg3[%c1_136, %c2_137] : memref<4x4xf32, #tpu.memory_space<smem>>
    %336 = vector.broadcast %335 : f32 to vector<128xf32>
    %337 = arith.mulf %334, %336 : vector<128xf32>
    %338 = arith.addf %332, %337 : vector<128xf32>
    %339 = vector.extract_strided_slice %3 {offsets = [1, 2, 0], sizes = [1, 1, 128], strides = [1, 1, 1]} : vector<2x4x128xf32> to vector<1x1x128xf32>
    %340 = vector.shape_cast %339 : vector<1x1x128xf32> to vector<128xf32>
    %c2_138 = arith.constant 2 : index
    %c2_139 = arith.constant 2 : index
    %341 = memref.load %arg3[%c2_138, %c2_139] : memref<4x4xf32, #tpu.memory_space<smem>>
    %342 = vector.broadcast %341 : f32 to vector<128xf32>
    %343 = arith.mulf %340, %342 : vector<128xf32>
    %344 = arith.addf %338, %343 : vector<128xf32>
    %345 = vector.extract_strided_slice %3 {offsets = [1, 3, 0], sizes = [1, 1, 128], strides = [1, 1, 1]} : vector<2x4x128xf32> to vector<1x1x128xf32>
    %346 = vector.shape_cast %345 : vector<1x1x128xf32> to vector<128xf32>
    %c3_140 = arith.constant 3 : index
    %c2_141 = arith.constant 2 : index
    %347 = memref.load %arg3[%c3_140, %c2_141] : memref<4x4xf32, #tpu.memory_space<smem>>
    %348 = vector.broadcast %347 : f32 to vector<128xf32>
    %349 = arith.mulf %346, %348 : vector<128xf32>
    %350 = arith.addf %344, %349 : vector<128xf32>
    %c1_142 = arith.constant 1 : index
    %c2_143 = arith.constant 2 : index
    %351 = memref.load %arg4[%c1_142, %c2_143] : memref<2x4xf32, #tpu.memory_space<smem>>
    %352 = vector.broadcast %351 : f32 to vector<128xf32>
    %353 = arith.addf %350, %352 : vector<128xf32>
    %354 = vector.extract_strided_slice %3 {offsets = [1, 2, 0], sizes = [1, 1, 128], strides = [1, 1, 1]} : vector<2x4x128xf32> to vector<1x1x128xf32>
    %355 = vector.shape_cast %354 : vector<1x1x128xf32> to vector<128xf32>
    %356 = vector.broadcast %7 : f32 to vector<128xf32>
    %357 = arith.mulf %356, %355 : vector<128xf32>
    %358 = vector.broadcast %9 : f32 to vector<128xf32>
    %359 = arith.mulf %358, %353 : vector<128xf32>
    %360 = arith.subf %357, %359 : vector<128xf32>
    %361 = vector.broadcast %11 : f32 to vector<128xf32>
    %362 = arith.mulf %361, %355 : vector<128xf32>
    %363 = vector.broadcast %13 : f32 to vector<128xf32>
    %364 = arith.mulf %363, %353 : vector<128xf32>
    %365 = arith.addf %362, %364 : vector<128xf32>
    %366 = vector.extract_strided_slice %5 {offsets = [1, 2, 0], sizes = [1, 1, 128], strides = [1, 1, 1]} : vector<2x4x128xf32> to vector<1x1x128xf32>
    %367 = vector.shape_cast %366 : vector<1x1x128xf32> to vector<128xf32>
    %368 = vector.broadcast %15 : f32 to vector<128xf32>
    %369 = arith.mulf %368, %367 : vector<128xf32>
    %370 = arith.addf %365, %369 : vector<128xf32>
    %c1_144 = arith.constant 1 : index
    %c2_145 = arith.constant 2 : index
    %c0_146 = arith.constant 0 : index
    %371 = vector.load %arg11[%c1_144, %c2_145, %c0_146] : memref<2x4x128xf32, #tpu.memory_space<vmem>>, vector<1x1x128xf32>
    %372 = vector.shape_cast %371 : vector<1x1x128xf32> to vector<128xf32>
    %373 = vector.shape_cast %370 : vector<128xf32> to vector<1x1x128xf32>
    tpu.vector_store %arg11[%c1_144, %c2_145, %c0_146], %373 {strides = array<i32>} : memref<2x4x128xf32, #tpu.memory_space<vmem>>, vector<1x1x128xf32>,
    %c0_147 = arith.constant 0 : index
    %c1_148 = arith.constant 1 : index
    %c2_149 = arith.constant 2 : index
    %c0_150 = arith.constant 0 : index
    %374 = vector.load %arg9[%c0_147, %c1_148, %c2_149, %c0_150] : memref<1x2x4x128xf32, #tpu.memory_space<vmem>>, vector<1x1x1x128xf32>
    %375 = vector.shape_cast %374 : vector<1x1x1x128xf32> to vector<128xf32>
    %376 = vector.shape_cast %370 : vector<128xf32> to vector<1x1x1x128xf32>
    tpu.vector_store %arg9[%c0_147, %c1_148, %c2_149, %c0_150], %376 {strides = array<i32>} : memref<1x2x4x128xf32, #tpu.memory_space<vmem>>, vector<1x1x1x128xf32>,
    %c0_151 = arith.constant 0 : index
    %c1_152 = arith.constant 1 : index
    %c2_153 = arith.constant 2 : index
    %c0_154 = arith.constant 0 : index
    %377 = vector.load %arg10[%c0_151, %c1_152, %c2_153, %c0_154] : memref<1x2x4x128xf32, #tpu.memory_space<vmem>>, vector<1x1x1x128xf32>
    %378 = vector.shape_cast %377 : vector<1x1x1x128xf32> to vector<128xf32>
    %379 = vector.shape_cast %360 : vector<128xf32> to vector<1x1x1x128xf32>
    tpu.vector_store %arg10[%c0_151, %c1_152, %c2_153, %c0_154], %379 {strides = array<i32>} : memref<1x2x4x128xf32, #tpu.memory_space<vmem>>, vector<1x1x1x128xf32>,
    %380 = vector.extract_strided_slice %3 {offsets = [1, 0, 0], sizes = [1, 1, 128], strides = [1, 1, 1]} : vector<2x4x128xf32> to vector<1x1x128xf32>
    %381 = vector.shape_cast %380 : vector<1x1x128xf32> to vector<128xf32>
    %c0_155 = arith.constant 0 : index
    %c3_156 = arith.constant 3 : index
    %382 = memref.load %arg3[%c0_155, %c3_156] : memref<4x4xf32, #tpu.memory_space<smem>>
    %383 = vector.broadcast %382 : f32 to vector<128xf32>
    %384 = arith.mulf %381, %383 : vector<128xf32>
    %385 = vector.extract_strided_slice %3 {offsets = [1, 1, 0], sizes = [1, 1, 128], strides = [1, 1, 1]} : vector<2x4x128xf32> to vector<1x1x128xf32>
    %386 = vector.shape_cast %385 : vector<1x1x128xf32> to vector<128xf32>
    %c1_157 = arith.constant 1 : index
    %c3_158 = arith.constant 3 : index
    %387 = memref.load %arg3[%c1_157, %c3_158] : memref<4x4xf32, #tpu.memory_space<smem>>
    %388 = vector.broadcast %387 : f32 to vector<128xf32>
    %389 = arith.mulf %386, %388 : vector<128xf32>
    %390 = arith.addf %384, %389 : vector<128xf32>
    %391 = vector.extract_strided_slice %3 {offsets = [1, 2, 0], sizes = [1, 1, 128], strides = [1, 1, 1]} : vector<2x4x128xf32> to vector<1x1x128xf32>
    %392 = vector.shape_cast %391 : vector<1x1x128xf32> to vector<128xf32>
    %c2_159 = arith.constant 2 : index
    %c3_160 = arith.constant 3 : index
    %393 = memref.load %arg3[%c2_159, %c3_160] : memref<4x4xf32, #tpu.memory_space<smem>>
    %394 = vector.broadcast %393 : f32 to vector<128xf32>
    %395 = arith.mulf %392, %394 : vector<128xf32>
    %396 = arith.addf %390, %395 : vector<128xf32>
    %397 = vector.extract_strided_slice %3 {offsets = [1, 3, 0], sizes = [1, 1, 128], strides = [1, 1, 1]} : vector<2x4x128xf32> to vector<1x1x128xf32>
    %398 = vector.shape_cast %397 : vector<1x1x128xf32> to vector<128xf32>
    %c3_161 = arith.constant 3 : index
    %c3_162 = arith.constant 3 : index
    %399 = memref.load %arg3[%c3_161, %c3_162] : memref<4x4xf32, #tpu.memory_space<smem>>
    %400 = vector.broadcast %399 : f32 to vector<128xf32>
    %401 = arith.mulf %398, %400 : vector<128xf32>
    %402 = arith.addf %396, %401 : vector<128xf32>
    %c1_163 = arith.constant 1 : index
    %c3_164 = arith.constant 3 : index
    %403 = memref.load %arg4[%c1_163, %c3_164] : memref<2x4xf32, #tpu.memory_space<smem>>
    %404 = vector.broadcast %403 : f32 to vector<128xf32>
    %405 = arith.addf %402, %404 : vector<128xf32>
    %406 = vector.extract_strided_slice %3 {offsets = [1, 3, 0], sizes = [1, 1, 128], strides = [1, 1, 1]} : vector<2x4x128xf32> to vector<1x1x128xf32>
    %407 = vector.shape_cast %406 : vector<1x1x128xf32> to vector<128xf32>
    %408 = vector.broadcast %7 : f32 to vector<128xf32>
    %409 = arith.mulf %408, %407 : vector<128xf32>
    %410 = vector.broadcast %9 : f32 to vector<128xf32>
    %411 = arith.mulf %410, %405 : vector<128xf32>
    %412 = arith.subf %409, %411 : vector<128xf32>
    %413 = vector.broadcast %11 : f32 to vector<128xf32>
    %414 = arith.mulf %413, %407 : vector<128xf32>
    %415 = vector.broadcast %13 : f32 to vector<128xf32>
    %416 = arith.mulf %415, %405 : vector<128xf32>
    %417 = arith.addf %414, %416 : vector<128xf32>
    %418 = vector.extract_strided_slice %5 {offsets = [1, 3, 0], sizes = [1, 1, 128], strides = [1, 1, 1]} : vector<2x4x128xf32> to vector<1x1x128xf32>
    %419 = vector.shape_cast %418 : vector<1x1x128xf32> to vector<128xf32>
    %420 = vector.broadcast %15 : f32 to vector<128xf32>
    %421 = arith.mulf %420, %419 : vector<128xf32>
    %422 = arith.addf %417, %421 : vector<128xf32>
    %c1_165 = arith.constant 1 : index
    %c3_166 = arith.constant 3 : index
    %c0_167 = arith.constant 0 : index
    %423 = vector.load %arg11[%c1_165, %c3_166, %c0_167] : memref<2x4x128xf32, #tpu.memory_space<vmem>>, vector<1x1x128xf32>
    %424 = vector.shape_cast %423 : vector<1x1x128xf32> to vector<128xf32>
    %425 = vector.shape_cast %422 : vector<128xf32> to vector<1x1x128xf32>
    tpu.vector_store %arg11[%c1_165, %c3_166, %c0_167], %425 {strides = array<i32>} : memref<2x4x128xf32, #tpu.memory_space<vmem>>, vector<1x1x128xf32>,
    %c0_168 = arith.constant 0 : index
    %c1_169 = arith.constant 1 : index
    %c3_170 = arith.constant 3 : index
    %c0_171 = arith.constant 0 : index
    %426 = vector.load %arg9[%c0_168, %c1_169, %c3_170, %c0_171] : memref<1x2x4x128xf32, #tpu.memory_space<vmem>>, vector<1x1x1x128xf32>
    %427 = vector.shape_cast %426 : vector<1x1x1x128xf32> to vector<128xf32>
    %428 = vector.shape_cast %422 : vector<128xf32> to vector<1x1x1x128xf32>
    tpu.vector_store %arg9[%c0_168, %c1_169, %c3_170, %c0_171], %428 {strides = array<i32>} : memref<1x2x4x128xf32, #tpu.memory_space<vmem>>, vector<1x1x1x128xf32>,
    %c0_172 = arith.constant 0 : index
    %c1_173 = arith.constant 1 : index
    %c3_174 = arith.constant 3 : index
    %c0_175 = arith.constant 0 : index
    %429 = vector.load %arg10[%c0_172, %c1_173, %c3_174, %c0_175] : memref<1x2x4x128xf32, #tpu.memory_space<vmem>>, vector<1x1x1x128xf32>
    %430 = vector.shape_cast %429 : vector<1x1x1x128xf32> to vector<128xf32>
    %431 = vector.shape_cast %412 : vector<128xf32> to vector<1x1x1x128xf32>
    tpu.vector_store %arg10[%c0_172, %c1_173, %c3_174, %c0_175], %431 {strides = array<i32>} : memref<1x2x4x128xf32, #tpu.memory_space<vmem>>, vector<1x1x1x128xf32>,
    return
  }
  func.func @transform_0(%arg0: i32, %arg1: i32, %arg2: memref<3x8xf32, #tpu.memory_space<smem>>, %arg3: memref<4x4xf32, #tpu.memory_space<smem>>, %arg4: memref<2x4xf32, #tpu.memory_space<smem>>, %arg5: memref<3xi32, #tpu.memory_space<smem>>, %arg6: memref<3xi32, #tpu.memory_space<smem>>) -> (i32, i32, i32) {
    %c0_i32 = arith.constant 0 : i32
    %c0_i32_0 = arith.constant 0 : i32
    %c0_i32_1 = arith.constant 0 : i32
    return %c0_i32, %c0_i32_0, %arg0 : i32, i32, i32
  }
  func.func @transform_1(%arg0: i32, %arg1: i32, %arg2: memref<3x8xf32, #tpu.memory_space<smem>>, %arg3: memref<4x4xf32, #tpu.memory_space<smem>>, %arg4: memref<2x4xf32, #tpu.memory_space<smem>>, %arg5: memref<3xi32, #tpu.memory_space<smem>>, %arg6: memref<3xi32, #tpu.memory_space<smem>>) -> (i32, i32, i32, i32) {
    %0 = arith.index_cast %arg1 : i32 to index
    %1 = memref.load %arg6[%0] : memref<3xi32, #tpu.memory_space<smem>>
    %c0_i32 = arith.constant 0 : i32
    %c0_i32_0 = arith.constant 0 : i32
    %c0_i32_1 = arith.constant 0 : i32
    return %1, %c0_i32, %c0_i32_0, %arg0 : i32, i32, i32, i32
  }
  func.func @transform_2(%arg0: i32, %arg1: i32, %arg2: memref<3x8xf32, #tpu.memory_space<smem>>, %arg3: memref<4x4xf32, #tpu.memory_space<smem>>, %arg4: memref<2x4xf32, #tpu.memory_space<smem>>, %arg5: memref<3xi32, #tpu.memory_space<smem>>, %arg6: memref<3xi32, #tpu.memory_space<smem>>) -> (i32, i32, i32, i32) {
    %0 = arith.index_cast %arg1 : i32 to index
    %1 = memref.load %arg5[%0] : memref<3xi32, #tpu.memory_space<smem>>
    %c0_i32 = arith.constant 0 : i32
    %c0_i32_0 = arith.constant 0 : i32
    %c0_i32_1 = arith.constant 0 : i32
    return %1, %c0_i32, %c0_i32_0, %arg0 : i32, i32, i32, i32
  }
  func.func @transform_3(%arg0: i32, %arg1: i32, %arg2: memref<3x8xf32, #tpu.memory_space<smem>>, %arg3: memref<4x4xf32, #tpu.memory_space<smem>>, %arg4: memref<2x4xf32, #tpu.memory_space<smem>>, %arg5: memref<3xi32, #tpu.memory_space<smem>>, %arg6: memref<3xi32, #tpu.memory_space<smem>>) -> (i32, i32, i32, i32) {
    %0 = arith.index_cast %arg1 : i32 to index
    %1 = memref.load %arg5[%0] : memref<3xi32, #tpu.memory_space<smem>>
    %c0_i32 = arith.constant 0 : i32
    %c0_i32_0 = arith.constant 0 : i32
    %c0_i32_1 = arith.constant 0 : i32
    return %1, %c0_i32, %c0_i32_0, %arg0 : i32, i32, i32, i32
  }
}

</mosaic_0001>

<bundles_post_ra>
// kernel: tpu_custom_call.1
= control target key start
LH: loop header
LB: loop body
LE: loop exit
PB: predicated region body
PF: predicated region fallthrough
CT: control target
= control target key end

     0   :  { %s2125_s0 = inlined_call_operand.hbm [shape: f32[3,8], index: 0, kind: input, shape index: {}]   ;;  %s2126_s5 = inlined_call_operand.vmem [shape: f32[2,4,256], index: 5, kind: input, shape index: {}]   ;;  %s2127_s6 = inlined_call_operand.hbm [shape: f32[2,2,4,256], index: 6, kind: input, shape index: {}]   ;;  %s2128_s7 = inlined_call_operand.hbm [shape: f32[2,2,4,256], index: 7, kind: output, shape index: {0}]   ;;  %s2129_s8 = inlined_call_operand.hbm [shape: f32[2,2,4,256], index: 8, kind: output, shape index: {1}]   ;;  %s2130_s1 = inlined_call_operand.hbm [shape: f32[4,4], index: 1, kind: input, shape index: {}]   ;;  %s2131_s2 = inlined_call_operand.vmem [shape: f32[2,4], index: 2, kind: input, shape index: {}]   ;;  %s2132_s3 = inlined_call_operand.hbm [shape: s32[3], index: 3, kind: input, shape index: {}]   ;;  %s2133_s4 = inlined_call_operand.hbm [shape: s32[3], index: 4, kind: input, shape index: {}]  }
   0x1   :  { %2155 = sst [smem:[#allocation40_spill]] %s2126_s5  ;;  %s1072_s29 = scalar_lea.hbm %s2125_s0, 64 }
   0x2   :  { %2156 = sst [smem:[#allocation41_spill]] %s2127_s6  ;;  %p1073_p0 = scmp.ne.s32.totalorder %s2125_s0, %s1072_s29 }
   0x3   :  { %2157 = sst [smem:[#allocation42_spill]] %s2128_s7  ;;  %p1076_p1 = scmp.lt.u32.totalorder %s1072_s29, %s2125_s0 }
   0x4   :  { %2158 = sst [smem:[#allocation43_spill]] %s2129_s8 }
   0x5   :  { %p1078_p2 = pnand %p1076_p1, %p1073_p0 }
   0x7   :  { %1081 = shalt.err (!%p1078_p2)  }
   0x8   :  { %s1350_s12 = smov [#allocation4]   ;;  %s1082_s17 = scalar_lea.hbm %s2130_s1, 64 }
   0x9   :  { %15 = dma.hbm_to_smem %s2125_s0, 64, %s1350_s12, [#allocation3] }
   0xa   :  { %p1083_p3 = scmp.ne.s32.totalorder %s2130_s1, %s1082_s17  ;;  %p1086_p4 = scmp.lt.u32.totalorder %s1082_s17, %s2130_s1 }
   0xc   :  { %p1088_p5 = pnand %p1086_p4, %p1083_p3 }
   0xe   :  { %1091 = shalt.err (!%p1088_p5)  }
   0xf   :  { %s1351_s22 = smov [#allocation5]   ;;  %s18_s26 = sshll.u32 %s2131_s2, 4  ;;  %s19_s26 = int_to_ptr.vmem [resolvable:$true] %s18_s26 }
  0x10   :  { %17 = dma.hbm_to_smem %s2130_s1, 64, %s1351_s22, [#allocation3] }
  0x11   :  { %s1092_s27 = scalar_lea.vmem %s19_s26, 32  ;;  %p1097_p7 = scmp.lt.s32.totalorder %s19_s26, %s19_s26 }
  0x12   :  { %p1093_p6 = scmp.ne.s32.totalorder %s19_s26, %s1092_s27  ;;  %p1098_p8 = scmp.lt.s32.totalorder %s1092_s27, %s1092_s27 }
  0x14   :  { %p1099_p9 = por %p1098_p8, %p1097_p7 }
  0x16   :  { %p1100_p10 = pnand %p1099_p9, %p1093_p6 }
  0x18   :  { %1103 = shalt.err (!%p1100_p10)  }
  0x19   :  { %s1352_s28 = smov [#allocation6]   ;;  %s1104_s9 = scalar_lea.hbm %s2132_s3, 16 }
  0x1a   :  { %21 = dma.vmem_to_smem %s19_s26, 32, %s1352_s28, [#allocation3] }
  0x1b   :  { %p1105_p11 = scmp.ne.s32.totalorder %s2132_s3, %s1104_s9  ;;  %p1108_p12 = scmp.lt.u32.totalorder %s1104_s9, %s2132_s3 }
  0x1d   :  { %p1110_p13 = pnand %p1108_p12, %p1105_p11 }
  0x1f   :  { %1113 = shalt.err (!%p1110_p13)  }
  0x20   :  { %s1353_s12 = smov [#allocation7]   ;;  %s1114_s17 = scalar_lea.hbm %s2133_s4, 16 }
  0x21   :  { %23 = dma.hbm_to_smem %s2132_s3, 16, %s1353_s12, [#allocation3] }
  0x22   :  { %p1115_p0 = scmp.ne.s32.totalorder %s2133_s4, %s1114_s17  ;;  %p1118_p1 = scmp.lt.u32.totalorder %s1114_s17, %s2133_s4 }
  0x24   :  { %p1120_p2 = pnand %p1118_p1, %p1115_p0 }
  0x26   :  { %1123 = shalt.err (!%p1120_p2)  }
  0x27   :  { %s1354_s22 = smov [#allocation8]  }
  0x28   :  { %25 = dma.hbm_to_smem %s2133_s4, 16, %s1354_s22, [#allocation3] }
  0x29   :  { %1272 = dma.done.wait [#allocation3], 192 }
  0x2a   :  { %1273 = vsyncadd [#allocation3], 4294967104 }
  0x2b   :  { %27 = sfence }
  0x2c   :  { %28 = vsyncpa [#allocation11], 0 }
  0x2d   :  { %30 = vsyncpa [#allocation11 + $0x1], 0 }
  0x2e   :  { %31 = vsyncpa [#allocation12], 0 }
  0x2f   :  { %33 = vsyncpa [#allocation12 + $0x1], 0 }
  0x30   :  { %34 = vsyncpa [#allocation15], 0 }
  0x31   :  { %36 = vsyncpa [#allocation15 + $0x1], 0  ;;  %s1460_s3 = smov 0   ;;  %s1462_s0 = smov 0  }
  0x32   :  { %s1464_s25 = smov 0   ;;  %s1466_s26 = smov 0  }
  0x33   :  { %s1468_s27 = smov 0   ;;  %s1470_s4 = smov 0  }
  0x34   :  { %s1472_s28 = smov 0   ;;  %s1474_s29 = smov 0  }
  0x35   :  { %s1476_s30 = smov 0   ;;  %s1478_s9 = smov 0  }
  0x36   :  { %s1480_s10 = smov 0   ;;  %s1482_s1 = smov 0  }
  0x37   :  { %s1484_s11 = smov 0   ;;  %s1486_s2 = smov 0  }
  0x38   :  { %s1488_s12 = smov 0   ;;  %s1490_s13 = smov 0  }
  0x39 LB: > { %2159 = sst [smem:[#allocation23_spill]] %s1296_s25  ;;  %s2138_s14 = sadd.s32 4294967295, %s1348_s13   ;;  %s1348_s13 = sphi %s1490_s13, %s42_s13   ;;  %s1344_s12 = sphi %s1488_s12, %s2218_s12   ;;  %s1340_s2 = sphi %s1486_s2, %s2217_s2   ;;  %s1336_s11 = sphi %s1484_s11, %s2216_s11   ;;  %s1332_s1 = sphi %s1482_s1, %s2215_s1   ;;  %s1328_s10 = sphi %s1480_s10, %s2214_s10   ;;  %s1324_s9 = sphi %s1478_s9, %s2213_s9   ;;  %s1320_s30 = sphi %s1476_s30, %s2212_s30   ;;  %s1316_s29 = sphi %s1474_s29, %s2223_s29   ;;  %s1312_s28 = sphi %s1472_s28, %s2210_s28   ;;  %s1308_s4 = sphi %s1470_s4, %s2209_s4   ;;  %s1304_s27 = sphi %s1468_s27, %s2222_s27   ;;  %s1300_s26 = sphi %s1466_s26, %s2221_s26   ;;  %s1296_s25 = sphi %s1464_s25, %s2207_s25   ;;  %s1292_s0 = sphi %s1462_s0, %s2220_s0   ;;  %s1288_s3 = sphi %s1460_s3, %s2219_s3  }
  0x3a   : > { %2160 = sst [smem:[#allocation24_spill]] %s1308_s4  ;;  %s51_s16 = sadd.s32 1, %s1340_s2 }
  0x3b   : > { %2161 = sst [smem:[#allocation25_spill]] %s1316_s29  ;;  %s54_s17 = sadd.s32 1, %s1344_s12 }
  0x3c   : > { %2162 = sst [smem:[#allocation26_spill]] %s1320_s30  ;;  %p52_p3 = scmp.ge.s32.totalorder %s51_s16, 3 }
  0x3d   : > { %2163 = sst [smem:[#allocation27_spill]] %s1328_s10  ;;  %s61_s18 = sadd.s32 1, %s1328_s10 }
  0x3e   : > { %2164 = sst [smem:[#allocation28_spill]] %s1332_s1  ;;  %p68_p4 = scmp.ne.s32.totalorder %s1328_s10, %s1324_s9 }
  0x3f   : > { %2165 = sst [smem:[#allocation29_spill]] %s1336_s11  ;;  %p69_p5 = scmp.eq.s32.totalorder %s1348_s13, 0 }
  0x40   : > { %2166 = sst [smem:[#allocation30_spill]] %s1340_s2  ;;  %s2225_s16 = smov (%p52_p3, %s51_s16), 0 }
  0x41   : > { %2167 = sst [smem:[#allocation31_spill]] %s1344_s12  ;;  %s2227_s17 = smov (!%p52_p3, %s54_s17), %s1344_s12 }
  0x42   : > { %2168 = sst [smem:[#allocation32_spill]] %s2225_s16  ;;  %p1551_p6 = por %p69_p5, %p68_p4 }
  0x43   : > { %s84_s20 = sld [smem:[#allocation8 + %s1340_s2]]  ;;  %p56_p7 = scmp.ge.s32.totalorder %s2227_s17, 2 }
  0x44   : > { %s85_s21 = sld [smem:[#allocation8 + %s2225_s16]]  ;;  %s91_s22 = sadd.s32 1, %s1320_s30 }
  0x45   : > { %p98_p8 = scmp.ne.s32.totalorder %s1320_s30, %s1316_s29  ;;  %s2229_s17 = smov (%p56_p7, %s2227_s17), 0 }
  0x46   : > { %2170 = sst [smem:[#allocation33_spill]] %s2229_s17  ;;  %p104_p10 = scmp.ne.s32.totalorder %s1316_s29, %s1312_s28 }
  0x47   : > { %p1562_p9 = por %p98_p8, %p69_p5  ;;  %s1570_s24 = ssub.s32 %s1344_s12, %s2229_s17 }
  0x48   : > { %p105_p11 = scmp.eq.s32.totalorder %s2138_s14, 0  ;;  %p59_p12 = scmp.eq.s32.totalorder %s1570_s24, 0 }
  0x49   : > { %s114_s15 = sld [smem:[#allocation7 + %s1340_s2]]  ;;  %s121_s14 = sadd.s32 1, %s1308_s4 }
  0x4a   : > { %s86_s7 = ssub.s32 %s84_s20, %s85_s21  ;;  %p1576_p13 = por %p105_p11, %p104_p10 }
  0x4b   : > { %s1581_s28 = scalar_select %p59_p12, %s1328_s10, %s61_s18  }
  0x4c   : > { %s2172_s8 = scalar_select %p1576_p13, 1, 0 }
  0x4d   : > { %2174 = sst [smem:[#allocation35_spill]] %s1581_s28  ;;  %s88_s11 = sor.u32 %s86_s7, %s1570_s24 }
  0x4e   : > { %2173 = sst [smem:[#allocation34_spill]] %s2172_s8  ;;  %p89_p0 = scmp.eq.s32.totalorder %s88_s11, 0 }
  0x4f   : > { %s115_s17 = sld [smem:[#allocation7 + %s2225_s16]]  ;;  %p131_p1 = scmp.ne.s32.totalorder %s1308_s4, %s1304_s27 }
  0x50   : > { %s2175_s1 = sadd.s32 4294967295, %s1348_s13   ;;  %p137_p4 = scmp.ne.s32.totalorder %s1304_s27, %s1300_s26 }
  0x51   : > { %p1590_p2 = scmp.eq.s32.totalorder %s2175_s1, 5  ;;  %s2179_s11 = sadd.s32 4294967294, %s1348_s13  }
  0x52   : > { %s1595_s21 = scalar_select %p89_p0, %s1320_s30, %s91_s22  }
  0x53   : > { %p1599_p3 = por %p1590_p2, %p131_p1  ;;  %p138_p5 = scmp.eq.s32.totalorder %s2179_s11, 5 }
  0x54   : > { %2177 = sst [smem:[#allocation36_spill]] %s1595_s21  ;;  %p161_p10 = scmp.ne.s32.totalorder %s1296_s25, %s1292_s0 }
  0x55   : > { %s2178_s7 = scalar_select %p1599_p3, 1, 0 }
  0x56   : > { %s144_s18 = sld [smem:[#allocation7 + %s1340_s2]]  ;;  %s116_s1 = ssub.s32 %s114_s15, %s115_s17 }
  0x57   : > { %s145_s28 = sld [smem:[#allocation7 + %s2225_s16]]  ;;  %s118_s8 = sor.u32 %s116_s1, %s1570_s24 }
  0x58   : > { %p1610_p7 = por %p138_p5, %p137_p4  ;;  %p119_p8 = scmp.eq.s32.totalorder %s118_s8, 0 }
  0x59   : > { %p167_p11 = scmp.ne.s32.totalorder %s1292_s0, %s1288_s3  ;;  %p1623_p12 = por %p161_p10, %p1590_p2 }
  0x5a   : > { %s2180_s29 = scalar_select %p1610_p7, 1, 0 }
  0x5b   : > { %s1619_s22 = scalar_select %p119_p8, %s1308_s4, %s121_s14  }
  0x5c   : > { %s2182_s21 = scalar_select %p1623_p12, 1, 0 }
  0x5d   : > { %2181 = sst [smem:[#allocation37_spill]] %s1619_s22  ;;  %p1627_p0 = por %p167_p11, %p138_p5 }
  0x5e   : > { %s146_s15 = ssub.s32 %s144_s18, %s145_s28  ;;  %s151_s1 = sadd.s32 1, %s1296_s25 }
  0x5f   : > { %s2183_s11 = scalar_select %p1627_p0, 1, 0 }
  0x60   : > { %s148_s17 = sor.u32 %s146_s15, %s1570_s24  ;;  %p847_p4 = scmp.ge.s32.totalorder %s1348_s13, 6 }
  0x61   : > { %2184 = sst [smem:[#allocation38_spill]] %s2183_s11  ;;  %p149_p1 = scmp.eq.s32.totalorder %s148_s17, 0 }
  0x62   : > { %184 = sbr.rel (%p847_p4) target bundleno = 154 (0x9a), region = 16 }
  0x63   : > { %s1634_s16 = scalar_select %p149_p1, %s1296_s25, %s151_s1  }
  0x65   : > { %2185 = sst [smem:[#allocation39_spill]] %s1634_s16 }
  0x69   : > { %187 = sbr.rel (!%p1551_p6) target bundleno = 116 (0x74), region = 20  ;;  %s189_s8 = sand.u32 (%p1551_p6), 1, %s1328_s10  }
  0x6a   : > { %s849_s14 = sshll.u32 (%p1551_p6), %s1344_s12, 2  ;;  %s848_s20 = sshll.u32 (%p1551_p6), %s189_s8, 3 }
  0x6b   : > { %s2186_s5 = sld [smem:[#allocation40_spill]] (%p1551_p6)  ;;  %s191_s24 = scalar_lea.vmem (%p1551_p6), [#allocation9], %s848_s20 }
  0x71   : > { %s193_s28 = scalar_lea.vmem %s2186_s5, %s849_s14 }
  0x72   : > { %v209_v0 = vld [vmem:[%s193_s28] sm:$0xf]  ;;  %v211_v1 = vld [vmem:[%s193_s28 + $0x8] sm:$0xf] }
  0x73   : > { %210 = vst [vmem:[%s191_s24] sm:$0xf] %v209_v0  ;;  %212 = vst [vmem:[%s191_s24 + $0x4] sm:$0xf] %v211_v1 }
  0x74 PF: > { %s240_s19 = sand.u32 1, %s1320_s30   ;;  %s2187_s6 = sld [smem:[#allocation41_spill]] }
  0x75   : > { %s850_s18 = sshll.u32 %s240_s19, 3  ;;  %s1658_s10 = scalar_lea.sflag [#allocation11], %s240_s19 }
  0x76   : > { %s913_s15 = scalar_select %p1562_p9, [#allocation8], [#allocation16] }
  0x77   : > { %s914_s17 = scalar_select %p1562_p9, %s1340_s2, 0 }
  0x78   : > { %s244_s22 = scalar_lea.vmem [#allocation10], %s850_s18 }
  0x79   : > { %s245_s4 = sld [smem:[%s913_s15 + %s914_s17]]  ;;  %s253_s1 = sshll.u32 %s244_s22, 4  ;;  %s1651_s1 = int_to_ptr.vmem [resolvable:$true] %s253_s1 }
  0x7a   : > { %s1128_s17 = scalar_lea.hbm %s2187_s6, 512 }
  0x7f   : > { %s851_s8 = sshll.u32 %s245_s4, 2 }
  0x80   : > { %s250_s14 = sadd.s32 %s1344_s12, %s851_s8 }
  0x81   : > { %s852_s20 = sshll.u32 %s250_s14, 6 }
  0x82   : > { %s1656_s5 = scalar_lea.hbm %s2187_s6, %s852_s20 }
  0x83   : > { %s1124_s2 = scalar_lea.hbm %s1656_s5, 128  ;;  %p1129_p8 = scmp.lt.u32.totalorder %s1656_s5, %s2187_s6 }
  0x84   : > { %p1125_p6 = scmp.ne.s32.totalorder %s1656_s5, %s1124_s2  ;;  %p1130_p10 = scmp.lt.u32.totalorder %s1128_s17, %s1124_s2 }
  0x85   : > { %p1132_p1 = scmp.lt.u32.totalorder %s1124_s2, %s1656_s5 }
  0x86   : > { %p1126_p2 = pnand %p1125_p6, %p1562_p9  ;;  %p1131_p11 = por %p1130_p10, %p1129_p8 }
  0x88   : > { %p1127_p5 = pneg %p1126_p2  ;;  %p1133_p4 = por %p1132_p1, %p1131_p11 }
  0x8a   : > { %p1134_p0 = pnand %p1133_p4, %p1127_p5 }
  0x8c   : > { %1137 = shalt.err (!%p1134_p0)
}
  0x8d   : > { %s1138_s19 = scalar_lea.vmem %s1651_s1, 128  ;;  %s1355_s8 = smov [#allocation10]  }
  0x8e   : > { %p1139_p6 = scmp.ne.s32.totalorder %s1651_s1, %s1138_s19  ;;  %s1142_s14 = sshll.u32 %s1355_s8, 4  ;;  %s1143_s14 = int_to_ptr.vmem [resolvable:$false] %s1142_s14 }
  0x8f   : > { %s1144_s20 = scalar_lea.vmem %s1143_s14, 256  ;;  %p1145_p3 = scmp.lt.s32.totalorder %s1651_s1, %s1143_s14 }
  0x90   : > { %p1140_p2 = pnand %p1139_p6, %p1562_p9  ;;  %p1146_p12 = scmp.lt.s32.totalorder %s1144_s20, %s1138_s19 }
  0x92   : > { %p1141_p7 = pneg %p1140_p2  ;;  %p1147_p8 = por %p1146_p12, %p1145_p3 }
  0x94   : > { %p1148_p10 = pnand %p1147_p8, %p1141_p7 }
  0x96   : > { %1151 = shalt.err (!%p1148_p10)
}
  0x97   : > { %s1356_s2 = smov 128   ;;  %s1357_s28 = smov 64  }
  0x98   : > { %s1358_s24 = smov 4  }
  0x99   : > { %915 = dma.hbm_to_vmem [thread:$0]  (%p1562_p9), %s1656_s5, 128, %s1651_s1, %s1658_s10, %s1356_s2, %s1357_s28, %s1358_s24  }
  0x9a PF: > { %p853_p0 = scmp.ge.s32.totalorder %s1348_s13, 1  ;;  %p261_p5 = scmp.lt.s32.totalorder %s1348_s13, 7 }
  0x9c   : > { %p262_p11 = pnand %p853_p0, %p261_p5 }
  0x9d   : > { %s2188_s18 = sld [smem:[#allocation25_spill]] (!%p262_p11)  ;;  %s268_s17 = sand.u32 (!%p262_p11), 1, %s1324_s9  }
  0x9e   : > { %265 = sbr.rel (%p262_p11) target bundleno = 283 (0x11b), region = 65  ;;  %s854_s22 = sshll.u32 (!%p262_p11), %s268_s17, 3 }
  0x9f   : > { %s270_s8 = scalar_lea.vmem (!%p262_p11), [#allocation9], %s854_s22 }
  0xa3   : > { %s274_s4 = sand.u32 (!%p262_p11), 1, %s2188_s18  }
  0xa4   : > { %s1686_s19 = sshll.u32 (!%p262_p11), %s274_s4, 3  ;;  %s275_s14 = scalar_lea.sflag (!%p262_p11), [#allocation11], %s274_s4 }
  0xa5   : > { %1275 = dma.done.wait (%p1576_p13), %s275_s14, 128  }
  0xa6   : > { %1277 = vsyncadd (%p1576_p13), %s275_s14, 4294967168  ;;  %s2149_s5 = sand.u32 1, %s1304_s27   ;;  %s2150_s10 = sand.u32 1, %s1292_s0  }
  0xa7   : > { %s856_s9 = sshll.u32 %s2149_s5, 3  ;;  %s857_s1 = sshll.u32 %s2150_s10, 3 }
  0xa8   : > { %s1699_s20 = scalar_lea.vmem [#allocation13], %s856_s9  ;;  %s1701_s2 = scalar_lea.vmem [#allocation14], %s857_s1 }
  0xa9   : > { %s2190_s28 = sld [smem:[#allocation28_spill]] }
  0xaf   : > { %p858_p9 = scmp.ne.s32.totalorder %s2190_s28, 0 }
  0xb0   : > { %v317_v2 = vld [vmem:[%s270_s8] sm:$0xff] (!%p858_p9)  }
  0xb1   : > { %316 = sbr.rel (%p858_p9) target bundleno = 184 (0xb8), region = 77  ;;  %319 = vst [vmem:[#allocation2] sm:$0xff] (!%p858_p9), %v317_v2  }
  0xb8 PF: > { %s2191_s24 = sld [smem:[#allocation28_spill]]  ;;  %s1705_s5 = sld [smem:[#allocation5]]  ;;  %v1719_v3 = vld [vmem:[#allocation2] sm:$0xf]  ;;  %v1739_v9 = vld [vmem:[#allocation2 + $0x4] sm:$0xf] }
  0xb9   : > { %s1709_s1 = sld [smem:[#allocation5 + $0x80]]  ;;  %s2192_s6 = scalar_lea.vmem [#allocation10], %s1686_s19 }
  0xba   : > { %s1711_s28 = sld [smem:[#allocation5 + $0x100]]  ;;  %v323_v4 = vld [vmem:[%s2192_s6] sm:$0xf]  ;;  %s1727_s12 = sld [smem:[#allocation5 + $0x81]] }
  0xbb   : > { %s1713_s8 = sld [smem:[#allocation5 + $0x180]]  ;;  %s1735_s30 = sld [smem:[#allocation5 + $0x101]] }
  0xbc   : > { %s1715_s10 = sld [smem:[#allocation6]]  ;;  %s1744_s6 = sld [smem:[#allocation6 + $0x1]] }
  0xbd   : > { %s1786_s16 = sld [smem:[#allocation5 + $0x83]]  ;;  %s1835_s11 = sld [smem:[#allocation6 + $0x80]] }
  0xbe   : > { %s859_s18 = sshll.u32 %s2191_s24, 7  ;;  %v336_v6 = vstv %s1705_s5  ;;  %s1746_s5 = sld [smem:[#allocation5 + $0x2]] }
  0xbf   : > { %s329_s15 = sadd.s32 2, %s859_s18  ;;  %s331_s17 = sadd.s32 3, %s859_s18  ;;  %v337_v10 = vmul.f32 %v336_v6, %v1719_v3  ;;  %v339_v11 = vstv %s1709_s1  ;;  %v1759_v17 = vmul.f32 %v336_v6, %v1739_v9 }
  0xc0   : > { %s330_s4 = sld [smem:[#allocation4 + %s329_s15]]  ;;  %s333_s14 = sadd.s32 4, %s859_s18  ;;  %v340_v14 = vmul.f32 %v339_v11, %v1719_v3  ;;  %v346_v15 = vstv %s1711_s28  ;;  %v506_v29 = vmul.f32 %v339_v11, %v1739_v9  ;;  %v382_v31 = vstv %s1727_s12 }
  0xc1   : > { %s332_s22 = sld [smem:[#allocation4 + %s331_s17]]  ;;  %s327_s15 = sadd.s32 1, %s859_s18  ;;  %v353_v16 = vstv %s1713_s8  ;;  %v347_v18 = vmul.f32 %v346_v15, %v1719_v3  ;;  %v389_v32 = vstv %s1735_s30  ;;  %v383_v35 = vmul.f32 %v382_v31, %v1719_v3 }
  0xc2   : > { %s1707_s9 = sld [smem:[#allocation4 + %s333_s14]]  ;;  %v354_v19 = vmul.f32 %v353_v16, %v1719_v3  ;;  %v342_v22 = vrot.slane %v340_v14, 1  ;;  %v360_v23 = vstv %s1715_s10  ;;  %v390_v36 = vmul.f32 %v389_v32, %v1719_v3  ;;  %s2193_s28 = scalar_lea.vmem [#allocation10], %s1686_s19 }
  0xc3   : > { %s1717_s23 = sld [smem:[#allocation4 + %s859_s18]]  ;;  %v349_v26 = vrot.slane %v347_v18, 2  ;;  %v385_v42 = vrot.slane %v383_v35, 1  ;;  %v403_v44 = vstv %s1744_s6  ;;  %v464_v60 = vstv %s1786_s16  ;;  %p2194_p13 = scmp.ne.s32.totalorder %s2182_s21, 0 }
  0xc4   : > { %s1721_s17 = sld [smem:[#allocation5 + $0x1]]  ;;  %s1772_s1 = sld [smem:[#allocation5 + $0x182]]  ;;  %v356_v27 = vrot.slane %v354_v19, 3  ;;  %v344_v30 = vadd.f32 %v342_v22, %v337_v10  ;;  %v420_v39 = vstv %s1746_s5  ;;  %v392_v43 = vrot.slane %v390_v36, 2 }
  0xc5   : > { %s1725_s14 = sld [smem:[#allocation4 + %s327_s15]]  ;;  %v421_v45 = vmul.f32 %v420_v39, %v1719_v3  ;;  %v465_v1 = vmul.f32 %v464_v60, %v1719_v3  ;;  %v513_v35 = vmul.f32 %v346_v15, %v1739_v9  ;;  %p2195_p3 = scmp.ne.s32.totalorder %s2178_s7, 0 }
  0xc6   : > { %v367_v5 = vstv %s330_s4  ;;  %s1737_s18 = sld [smem:[#allocation5 + $0x181]]  ;;  %s1754_s4 = sld [smem:[#allocation5 + $0x82]]  ;;  %v351_v38 = vadd.f32 %v349_v26, %v344_v30  ;;  %v508_v26 = vrot.slane %v506_v29, 1 }
  0xc7   : > { %v1731_v7 = vmul.f32 %v367_v5, %v1719_v3  ;;  %v1733_v8 = vstv %s332_s22  ;;  %v1749_v13 = vmul.f32 %v367_v5, %v1739_v9  ;;  %s1756_s22 = sld [smem:[#allocation5 + $0x102]]  ;;  %s1781_s15 = sld [smem:[#allocation5 + $0x3]]  ;;  %v467_v18 = vrot.slane %v465_v1, 1 }
  0xc8   : > { %v372_v12 = vstv %s1707_s9  ;;  %s1788_s25 = sld [smem:[#allocation5 + $0x103]]  ;;  %s1806_s10 = sld [smem:[#allocation6 + $0x2]]  ;;  %v358_v46 = vadd.f32 %v356_v27, %v351_v38  ;;  %v554_v1 = vmul.f32 %v389_v32, %v1739_v9 }
  0xc9   : > { %v1769_v20 = vmul.f32 %v372_v12, %v323_v4  ;;  %v362_v21 = vstv %s1717_s23  ;;  %s1833_s6 = sld [smem:[#allocation6 + $0x3]]  ;;  %s1898_s30 = sld [smem:[#allocation6 + $0x82]] }
  0xca   : > { %v1778_v24 = vmul.f32 %v362_v21, %v1719_v3  ;;  %v379_v25 = vstv %s1721_s17  ;;  %v437_v49 = vstv %s1772_s1  ;;  %v361_v54 = vadd.f32 %v360_v23, %v358_v46  ;;  %s920_s12 = scalar_select %p2194_p13, [#allocation7], [#allocation18] }
  0xcb   : > { %v1784_v28 = vstv %s1725_s14  ;;  %v380_v34 = vmul.f32 %v379_v25, %v1719_v3  ;;  %s1808_s14 = sld [smem:[#allocation5 + $0x183]]  ;;  %v438_v52 = vmul.f32 %v437_v49, %v1719_v3  ;;  %s686_s5 = sshll.u32 %s1699_s20, 4  ;;  %s2003_s5 = int_to_ptr.vmem [resolvable:$true] %s686_s5 }
  0xcc   : > { %v396_v33 = vstv %s1737_s18  ;;  %v423_v40 = vstv %s1754_s4  ;;  %v370_v62 = vmul.f32 %v1733_v8, %v361_v54  ;;  %v365_v63 = vmul.f32 %v1784_v28, %v361_v54  ;;  %s921_s19 = scalar_select %p2194_p13, %s2191_s24, 0 }
  0xcd   : > { %v397_v37 = vmul.f32 %v396_v33, %v1719_v3  ;;  %v430_v41 = vstv %s1756_s22  ;;  %v424_v47 = vmul.f32 %v423_v40, %v1719_v3  ;;  %v387_v50 = vadd.f32 %v385_v42, %v380_v34  ;;  %s917_s23 = scalar_select %p2195_p3, [#allocation7], [#allocation17] }
  0xce   : > { %v431_v48 = vmul.f32 %v430_v41, %v1719_v3  ;;  %v461_v53 = vstv %s1781_s15  ;;  %v440_v59 = vrot.slane %v438_v52, 3  ;;  %v471_v61 = vstv %s1788_s25  ;;  %s2231_s24 = smov (!%p2195_p3, %s2191_s24), 0  ;;  %s1943_s9 = sld [smem:[#allocation6 + $0x83]] }
  0xcf   : > { %v399_v51 = vrot.slane %v397_v37, 3  ;;  %v426_v55 = vrot.slane %v424_v47, 1  ;;  %v462_v57 = vmul.f32 %v461_v53, %v1719_v3  ;;  %v394_v58 = vadd.f32 %v392_v43, %v387_v50  ;;  %s1948_s8 = sld [smem:[%s920_s12 + %s921_s19]]  ;;  %s704_s1 = sshll.u32 %s1701_s2, 4  ;;  %s1994_s1 = int_to_ptr.vmem [resolvable:$true] %s704_s1 }
  0xd0   : > { %v433_v56 = vrot.slane %v431_v48, 2  ;;  %v444_v4 = vstv %s1806_s10  ;;  %v472_v5 = vmul.f32 %v471_v61, %v1719_v3  ;;  %v371_v10 = vadd.f32 %v370_v62, %v1731_v7  ;;  %s1961_s17 = sld [smem:[%s917_s23 + %s2231_s24]] }
  0xd1   : > { %v428_v0 = vadd.f32 %v426_v55, %v421_v45  ;;  %v401_v2 = vadd.f32 %v399_v51, %v394_v58  ;;  %v478_v6 = vstv %s1808_s14  ;;  %v366_v11 = vsub.f32 %v1778_v24, %v365_v63  ;;  %v324_v63 = vld [vmem:[%s2193_s28 + $0x4] sm:$0xf]  ;;  %s2196_s25 = sld [smem:[#allocation29_spill]] }
  0xd2   : > { %v474_v22 = vrot.slane %v472_v5, 2  ;;  %v479_v23 = vmul.f32 %v478_v6, %v1719_v3  ;;  %v374_v27 = vadd.f32 %v1769_v20, %v371_v10  ;;  %v469_v34 = vadd.f32 %v467_v18, %v462_v57  ;;  %s2198_s12 = sld [smem:[#allocation42_spill]] }
  0xd3   : > { %v435_v14 = vadd.f32 %v433_v56, %v428_v0  ;;  %v404_v19 = vadd.f32 %v403_v44, %v401_v2  ;;  %377 = vst [vmem:[%s1701_s2] sm:$0x1] %v366_v11  ;;  %v510_v42 = vadd.f32 %v508_v26, %v1759_v17  ;;  %v515_v43 = vrot.slane %v513_v35, 2 }
  0xd4   : > { %v481_v38 = vrot.slane %v479_v23, 3  ;;  %376 = vst [vmem:[%s1699_s20] sm:$0x1] %v374_v27  ;;  %375 = vst [vmem:[#allocation2] sm:$0x1] %v374_v27  ;;  %v476_v29 = vadd.f32 %v474_v22, %v469_v34  ;;  %v520_v44 = vmul.f32 %v353_v16, %v1739_v9  ;;  %v485_v15 = vstv %s1833_s6  ;;  %s2197_s6 = sld [smem:[#allocation43_spill]] }
  0xd5   : > { %v442_v30 = vadd.f32 %v440_v59, %v435_v14  ;;  %v410_v36 = vmul.f32 %v404_v19, %v1733_v8  ;;  %v405_v37 = vmul.f32 %v404_v19, %v1784_v28  ;;  %v526_v47 = vstv %s1835_s11  ;;  %s1878_s11 = sld [smem:[#allocation6 + $0x81]]  ;;  %s909_s16 = sshll.u32 %s1948_s8, 2 }
  0xd6   : > { %v483_v50 = vadd.f32 %v481_v38, %v476_v29  ;;  %v517_v51 = vadd.f32 %v515_v43, %v510_v42  ;;  %v522_v16 = vrot.slane %v520_v44, 3  ;;  %v1873_v55 = vmul.f32 %v362_v21, %v1739_v9  ;;  %s907_s24 = sshll.u32 %s1961_s17, 2  ;;  %s1152_s17 = scalar_lea.vmem %s1994_s1, 128 }
  0xd7   : > { %v445_v3 = vadd.f32 %v444_v4, %v442_v30  ;;  %v412_v45 = vrot.slane %v410_v36, 7  ;;  %v407_v46 = vrot.slane %v405_v37, 7  ;;  %v544_v59 = vmul.f32 %v379_v25, %v1739_v9  ;;  %s701_s18 = sadd.s32 %s2196_s25, %s909_s16  ;;  %s683_s4 = sadd.s32 %s2196_s25, %s907_s24 }
  0xd8   : > { %v486_v58 = vadd.f32 %v485_v15, %v483_v50  ;;  %v524_v0 = vadd.f32 %v522_v16, %v517_v51  ;;  %v547_v21 = vmul.f32 %v382_v31, %v1739_v9  ;;  %v556_v11 = vrot.slane %v554_v1, 2  ;;  %s910_s22 = sshll.u32 %s701_s18, 6  ;;  %s908_s15 = sshll.u32 %s683_s4, 6 }
  0xd9   : > { %v451_v48 = vmul.f32 %v445_v3, %v1733_v8  ;;  %v446_v17 = vmul.f32 %v445_v3, %v1784_v28  ;;  %v414_v52 = vadd.f32 %v412_v45, %v1731_v7  ;;  %v409_v54 = vsub.f32 %v1778_v24, %v407_v46  ;;  %s2199_s19 = smov %s2198_s12  ;;  %s2001_s23 = scalar_lea.hbm %s2198_s12, %s908_s15 }
  0xda   : > { %v492_v4 = vmul.f32 %v486_v58, %v1733_v8  ;;  %v487_v5 = vmul.f32 %v486_v58, %v1784_v28  ;;  %v527_v10 = vadd.f32 %v526_v47, %v524_v0  ;;  %v549_v31 = vrot.slane %v547_v21, 1  ;;  %p1153_p7 = scmp.ne.s32.totalorder %s1994_s1, %s1152_s17  ;;  %s1359_s25 = smov [#allocation14]  }
  0xdb   : > { %v453_v56 = vrot.slane %v451_v48, 6  ;;  %v448_v57 = vrot.slane %v446_v17, 6  ;;  %v415_v62 = vadd.f32 %v414_v52, %v1769_v20  ;;  %418 = vst [vmem:[%s1701_s2] sm:$0x2] %v409_v54  ;;  %v561_v32 = vmul.f32 %v396_v33, %v1739_v9  ;;  %s1156_s16 = sshll.u32 %s1359_s25, 4  ;;  %s1157_s16 = int_to_ptr.vmem [resolvable:$false] %s1156_s16 }
  0xdc   : > { %v494_v18 = vrot.slane %v492_v4, 5  ;;  %v489_v19 = vrot.slane %v487_v5, 5  ;;  %v1904_v22 = vmul.f32 %v372_v12, %v324_v63  ;;  %v532_v23 = vmul.f32 %v527_v10, %v1733_v8  ;;  %p1154_p12 = pnand %p1153_p7, %p2194_p13  ;;  %s1158_s24 = scalar_lea.vmem %s1157_s16, 256 }
  0xdd   : > { %v455_v2 = vadd.f32 %v453_v56, %v1731_v7  ;;  %v450_v25 = vsub.f32 %v1778_v24, %v448_v57  ;;  %417 = vst [vmem:[%s1699_s20] sm:$0x2] %v415_v62  ;;  %416 = vst [vmem:[#allocation2] sm:$0x2] %v415_v62  ;;  %v529_v33 = vmul.f32 %v527_v10, %v1784_v28  ;;  %v563_v27 = vrot.slane %v561_v32, 3  ;;  %p1159_p4 = scmp.lt.s32.totalorder %s1994_s1, %s1157_s16  ;;  %p1160_p6 = scmp.lt.s32.totalorder %s1158_s24, %s1152_s17 }
  0xde   : > { %v551_v26 = vadd.f32 %v549_v31, %v544_v59  ;;  %v496_v12 = vadd.f32 %v494_v18, %v1731_v7  ;;  %v491_v30 = vsub.f32 %v1778_v24, %v489_v19  ;;  %v585_v34 = vmul.f32 %v420_v39, %v1739_v9  ;;  %p1155_p1 = pneg %p1154_p12 }
  0xdf   : > { %v456_v14 = vadd.f32 %v455_v2, %v1769_v20  ;;  %459 = vst [vmem:[%s1701_s2] sm:$0x4] %v450_v25  ;;  %v588_v35 = vmul.f32 %v423_v40, %v1739_v9  ;;  %v533_v36 = vadd.f32 %v532_v23, %v1749_v13  ;;  %v530_v37 = vsub.f32 %v1873_v55, %v529_v33  ;;  %p1161_p2 = por %p1160_p6, %p1159_p4 }
  0xe0   : > { %v558_v38 = vadd.f32 %v556_v11, %v551_v26  ;;  %v595_v7 = vmul.f32 %v430_v41, %v1739_v9  ;;  %v497_v24 = vadd.f32 %v496_v12, %v1769_v20  ;;  %500 = vst [vmem:[%s1701_s2] sm:$0x8] %v491_v30  ;;  %v567_v39 = vstv %s1878_s11  ;;  %s1992_s11 = scalar_lea.hbm %s2197_s6, %s910_s22 }
  0xe1   : > { %458 = vst [vmem:[%s1699_s20] sm:$0x4] %v456_v14  ;;  %457 = vst [vmem:[#allocation2] sm:$0x4] %v456_v14  ;;  %v590_v40 = vrot.slane %v588_v35, 1  ;;  %v602_v42 = vmul.f32 %v437_v49, %v1739_v9  ;;  %v535_v3 = vadd.f32 %v1904_v22, %v533_v36  ;;  %v626_v41 = vmul.f32 %v461_v53, %v1739_v9  ;;  %p1162_p8 = pnand %p1161_p2, %p1155_p1 }
  0xe2   : > { %883 = vst [vmem:[%s1701_s2 + $0x4] sm:$0x1] %v530_v37  ;;  %v565_v29 = vadd.f32 %v563_v27, %v558_v38  ;;  %v597_v43 = vrot.slane %v595_v7, 2  ;;  %499 = vst [vmem:[%s1699_s20] sm:$0x8] %v497_v24  ;;  %v629_v44 = vmul.f32 %v464_v60, %v1739_v9  ;;  %v636_v45 = vmul.f32 %v471_v61, %v1739_v9 }
  0xe3   : > { %498 = vst [vmem:[#allocation2] sm:$0x8] %v497_v24  ;;  %v592_v20 = vadd.f32 %v590_v40, %v585_v34  ;;  %v604_v49 = vrot.slane %v602_v42, 3  ;;  %882 = vst [vmem:[%s1699_s20 + $0x4] sm:$0x1] %v535_v3  ;;  %v643_v46 = vmul.f32 %v478_v6, %v1739_v9  ;;  %v608_v50 = vstv %s1898_s30 }
  0xe4   : > { %537 = vst [vmem:[#allocation2 + $0x4] sm:$0x1] %v535_v3  ;;  %v568_v53 = vadd.f32 %v567_v39, %v565_v29  ;;  %v631_v47 = vrot.slane %v629_v44, 1  ;;  %v638_v48 = vrot.slane %v636_v45, 2  ;;  %v649_v58 = vstv %s1943_s9  ;;  %s2200_s9 = sand.u32 1, %s1292_s0  }
  0xe5   : > { %v599_v15 = vadd.f32 %v597_v43, %v592_v20  ;;  %v645_v52 = vrot.slane %v643_v46, 3  ;;  %s2007_s8 = scalar_lea.sflag [#allocation15], %s2200_s9 }
  0xe6   : > { %v574_v17 = vmul.f32 %v568_v53, %v1733_v8  ;;  %v569_v60 = vmul.f32 %v568_v53, %v1784_v28  ;;  %v633_v51 = vadd.f32 %v631_v47, %v626_v41 }
  0xe7   : > { %v606_v61 = vadd.f32 %v604_v49, %v599_v15 }
  0xe8   : > { %v576_v54 = vrot.slane %v574_v17, 7  ;;  %v571_v16 = vrot.slane %v569_v60, 7  ;;  %v640_v6 = vadd.f32 %v638_v48, %v633_v51 }
  0xe9   : > { %v609_v9 = vadd.f32 %v608_v50, %v606_v61 }
  0xea   : > { %v578_v56 = vadd.f32 %v576_v54, %v1749_v13  ;;  %v573_v57 = vsub.f32 %v1873_v55, %v571_v16  ;;  %v647_v63 = vadd.f32 %v645_v52, %v640_v6 }
  0xeb   : > { %v615_v59 = vmul.f32 %v609_v9, %v1733_v8  ;;  %v610_v62 = vmul.f32 %v609_v9, %v1784_v28 }
  0xec   : > { %v579_v0 = vadd.f32 %v578_v56, %v1904_v22  ;;  %890 = vst [vmem:[%s1701_s2 + $0x4] sm:$0x2] %v573_v57  ;;  %v650_v2 = vadd.f32 %v649_v58, %v647_v63 }
  0xed   : > { %v617_v21 = vrot.slane %v615_v59, 6  ;;  %v612_v1 = vrot.slane %v610_v62, 6 }
  0xee   : > { %889 = vst [vmem:[%s1699_s20 + $0x4] sm:$0x2] %v579_v0  ;;  %580 = vst [vmem:[#allocation2 + $0x4] sm:$0x2] %v579_v0  ;;  %v656_v5 = vmul.f32 %v650_v2, %v1733_v8  ;;  %v651_v10 = vmul.f32 %v650_v2, %v1784_v28 }
  0xef   : > { %v619_v25 = vadd.f32 %v617_v21, %v1749_v13  ;;  %v614_v4 = vsub.f32 %v1873_v55, %v612_v1 }
  0xf0   : > { %v658_v11 = vrot.slane %v656_v5, 5  ;;  %v653_v32 = vrot.slane %v651_v10, 5 }
  0xf1   : > { %v620_v31 = vadd.f32 %v619_v25, %v1904_v22  ;;  %897 = vst [vmem:[%s1701_s2 + $0x4] sm:$0x4] %v614_v4 }
  0xf2   : > { %v660_v14 = vadd.f32 %v658_v11, %v1749_v13  ;;  %v655_v8 = vsub.f32 %v1873_v55, %v653_v32 }
  0xf3   : > { %896 = vst [vmem:[%s1699_s20 + $0x4] sm:$0x4] %v620_v31  ;;  %621 = vst [vmem:[#allocation2 + $0x4] sm:$0x4] %v620_v31 }
  0xf4   : > { %v661_v28 = vadd.f32 %v660_v14, %v1904_v22  ;;  %904 = vst [vmem:[%s1701_s2 + $0x4] sm:$0x8] %v655_v8 }
  0xf5   : > { %1165 = shalt.err (!%p1162_p8)
}
  0xf6   : > { %s1166_s2 = scalar_lea.hbm %s1992_s11, 128  ;;  %s1170_s22 = scalar_lea.hbm %s2197_s6, 512 }
  0xf7   : > { %p1167_p10 = scmp.ne.s32.totalorder %s1992_s11, %s1166_s2  ;;  %p1171_p11 = scmp.lt.u32.totalorder %s1992_s11, %s2197_s6 }
  0xf8   : > { %p1172_p9 = scmp.lt.u32.totalorder %s1170_s22, %s1166_s2  ;;  %p1174_p12 = scmp.lt.u32.totalorder %s1166_s2, %s1992_s11 }
  0xf9   : > { %p1168_p0 = pnand %p1167_p10, %p2194_p13 }
  0xfa   : > { %p1173_p7 = por %p1172_p9, %p1171_p11 }
  0xfb   : > { %p1169_p5 = pneg %p1168_p0 }
  0xfc   : > { %p1175_p1 = por %p1174_p12, %p1173_p7 }
  0xfe   : > { %p1176_p4 = pnand %p1175_p1, %p1169_p5 }
 0x100   : > { %1179 = shalt.err (!%p1176_p4)
}
 0x101   : > { %s1360_s14 = smov 64   ;;  %s1361_s28 = smov 128   ;;  %903 = vst [vmem:[%s1699_s20 + $0x4] sm:$0x8] %v661_v28  ;;  %662 = vst [vmem:[#allocation2 + $0x4] sm:$0x8] %v661_v28 }
 0x102   : > { %s1362_s30 = smov 4   ;;  %s2201_s12 = sand.u32 1, %s1304_s27  }
 0x103   : > { %922 = dma.vmem_to_hbm [thread:$0]  (%p2194_p13), %s1994_s1, 128, %s1992_s11, %s2007_s8, %s1360_s14, %s1361_s28, %s1362_s30  }
 0x104   : > { %s2037_s9 = scalar_lea.sflag [#allocation12], %s2201_s12  ;;  %s1180_s17 = scalar_lea.vmem %s2003_s5, 128 }
 0x105   : > { %p1181_p6 = scmp.ne.s32.totalorder %s2003_s5, %s1180_s17  ;;  %s1363_s25 = smov [#allocation13]  }
 0x106   : > { %s1184_s16 = sshll.u32 %s1363_s25, 4  ;;  %s1185_s16 = int_to_ptr.vmem [resolvable:$false] %s1184_s16 }
 0x107   : > { %p1182_p2 = pnand %p1181_p6, %p2195_p3  ;;  %s1186_s24 = scalar_lea.vmem %s1185_s16, 256 }
 0x108   : > { %p1187_p10 = scmp.lt.s32.totalorder %s2003_s5, %s1185_s16  ;;  %p1188_p0 = scmp.lt.s32.totalorder %s1186_s24, %s1180_s17 }
 0x109   : > { %p1183_p8 = pneg %p1182_p2 }
 0x10a   : > { %p1189_p5 = por %p1188_p0, %p1187_p10 }
 0x10c   : > { %p1190_p11 = pnand %p1189_p5, %p1183_p8 }
 0x10e   : > { %1193 = shalt.err (!%p1190_p11)
}
 0x10f   : > { %s1194_s21 = scalar_lea.hbm %s2001_s23, 128  ;;  %s1198_s11 = scalar_lea.hbm %s2199_s19, 512 }
 0x110   : > { %p1195_p13 = scmp.ne.s32.totalorder %s2001_s23, %s1194_s21  ;;  %p1199_p12 = scmp.lt.u32.totalorder %s2001_s23, %s2199_s19 }
 0x111   : > { %p1200_p1 = scmp.lt.u32.totalorder %s1198_s11, %s1194_s21  ;;  %p1202_p6 = scmp.lt.u32.totalorder %s1194_s21, %s2001_s23 }
 0x112   : > { %p1196_p9 = pnand %p1195_p13, %p2195_p3 }
 0x113   : > { %p1201_p4 = por %p1200_p1, %p1199_p12 }
 0x114   : > { %p1197_p7 = pneg %p1196_p9 }
 0x115   : > { %p1203_p2 = por %p1202_p6, %p1201_p4 }
 0x117   : > { %p1204_p8 = pnand %p1203_p2, %p1197_p7 }
 0x119   : > { %1207 = shalt.err (!%p1204_p8)
}
 0x11a   : > { %919 = dma.vmem_to_hbm [thread:$0]  (%p2195_p3), %s2003_s5, 128, %s2001_s23, %s2037_s9, %s1360_s14, %s1361_s28, %s1362_s30  }
 0x11b PF: > { %p932_p10 = scmp.ge.s32.totalorder %s1348_s13, 2  ;;  %s719_s18 = sand.u32 1, %s1300_s26  }
 0x11c   : > { %p2202_p0 = scmp.ne.s32.totalorder %s2180_s29, 0  ;;  %s720_s4 = scalar_lea.sflag [#allocation12], %s719_s18 }
 0x11e   : > { %p926_p5 = pnand %p932_p10, %p2202_p0 }
 0x120   : > { %1279 = dma.done.wait (!%p926_p5), %s720_s4, 128  }
 0x121   : > { %1281 = vsyncadd (!%p926_p5), %s720_s4, 4294967168  ;;  %s2203_s7 = sld [smem:[#allocation38_spill]]  ;;  %s728_s22 = sand.u32 1, %s1288_s3  }
 0x122   : > { %s729_s15 = scalar_lea.sflag [#allocation15], %s728_s22 }
 0x127   : > { %p2204_p11 = scmp.ne.s32.totalorder %s2203_s7, 0 }
 0x129   : > { %p929_p13 = pnand %p932_p10, %p2204_p11 }
 0x12b   : > { %1283 = dma.done.wait (!%p929_p13), %s729_s15, 128  }
 0x12c   : > { %1285 = vsyncadd (!%p929_p13), %s729_s15, 4294967168  ;;  %s42_s13 = sadd.s32 1, %s1348_s13   ;;  %s2206_s26 = sld [smem:[#allocation23_spill]] }
 0x12d   : > { %p2072_p3 = scmp.ge.s32.totalorder %s42_s13, 8   ;;  %s2207_s25 = sld [smem:[#allocation39_spill]] }
 0x12e   : > { %s2208_s29 = sld [smem:[#allocation24_spill]]  ;;  %s2209_s4 = sld [smem:[#allocation37_spill]] }
 0x12f   : > { %s2210_s28 = sld [smem:[#allocation25_spill]]  ;;  %s2211_s23 = sld [smem:[#allocation26_spill]] }
 0x130   : > { %s2212_s30 = sld [smem:[#allocation36_spill]]  ;;  %s2213_s9 = sld [smem:[#allocation27_spill]] }
 0x131   : > { %s2214_s10 = sld [smem:[#allocation35_spill]]  ;;  %s2215_s1 = sld [smem:[#allocation30_spill]] }
 0x132   : > { %s2216_s11 = sld [smem:[#allocation31_spill]]  ;;  %s2217_s2 = sld [smem:[#allocation32_spill]] }
 0x133   : > { %s2218_s12 = sld [smem:[#allocation33_spill]]  ;;  %s2219_s3 = smov %s1292_s0 }
 0x134   : > { %s2220_s0 = smov %s2206_s26  ;;  %s2221_s26 = smov %s1304_s27 }
 0x135   : > { %s2222_s27 = smov %s2208_s29  ;;  %s2223_s29 = smov %s2211_s23 }
 0x136   :  { %41 = sbr.rel (!%p2072_p3) target bundleno = 57 (0x39), region = 146 }
 0x13d   :  { %734 = vsyncpa [#allocation11], 1 }
 0x13e   :  { %736 = vsyncpa [#allocation11 + $0x1], 1 }
 0x13f   :  { %737 = vsyncpa [#allocation12], 1 }
 0x140   :  { %739 = vsyncpa [#allocation12 + $0x1], 1 }
 0x141   :  { %740 = vsyncpa [#allocation15], 1 }
 0x142   :  { %742 = vsyncpa [#allocation15 + $0x1], 1 }

</bundles_post_ra>
